<compile_context>
chip_gen: v5e
topology: v5e:2x2
jax: 0.10.0
libtpu: 0.0.40
codegen_flags: <defaults>
</compile_context>

<pallas_src>
import math
import jax
import jax.numpy as jnp
from jax.experimental import pallas as pl
from jax.experimental.pallas import tpu as pltpu

# ---------------- config (small, consistent with the module) ----------------
D_MODEL       = 32
NUM_HEADS     = 4
D_HEAD        = D_MODEL // NUM_HEADS        # 8
D_FF          = 64
VOCAB_ENC     = 48
VOCAB_DEC     = 48
VOCAB_PAD     = 128                          # lane-dense padded logits width
MAX_LEN_ENC   = 8
MAX_LEN_DEC   = 8
BATCH         = 2
PAD_IDX       = 0
STOP_TOKEN    = 2
MASKING_VALUE = -1e9
NX            = 2
LN_EPS        = 1e-5

# ===================== in-kernel helpers (traced inside kernels) ============

def _ln(x, g, b):
    mu = jnp.mean(x, axis=-1, keepdims=True)
    var = jnp.mean(jnp.square(x - mu), axis=-1, keepdims=True)
    return (x - mu) * jax.lax.rsqrt(var + LN_EPS) * g + b


def _attend(q, k, v, wo, bo, mask):
    """q:(Lq,D)  k,v:(Lk,D)  wo:(D,D)  bo:(1,D)  mask:(Lq,Lk) additive or None.

    Per-head attention with the output projection folded into the head loop
    (head_h @ wo[h*Dh:(h+1)*Dh, :]) so no concat/transpose is needed."""
    Lq, D = q.shape
    scale = 1.0 / math.sqrt(D_HEAD)
    acc = jnp.zeros((Lq, D), jnp.float32)
    for h in range(NUM_HEADS):
        sl = slice(h * D_HEAD, (h + 1) * D_HEAD)
        qh, kh, vh = q[:, sl], k[:, sl], v[:, sl]
        s = jax.lax.dot_general(qh, kh, (((1,), (1,)), ((), ())),
                                preferred_element_type=jnp.float32) * scale
        if mask is not None:
            s = s + mask
        mx = jnp.max(s, axis=-1, keepdims=True)
        p = jnp.exp(s - mx)
        p = p / jnp.sum(p, axis=-1, keepdims=True)
        head = jnp.dot(p, vh, preferred_element_type=jnp.float32)          # (Lq, Dh)
        acc = acc + jnp.dot(head, wo[sl, :], preferred_element_type=jnp.float32)
    return acc + bo

# ========================= fused Pallas kernels =============================

def _encoder_layer_kernel(x_ref, wqkv_ref, bqkv_ref, wo_ref, bo_ref,
                          g1_ref, be1_ref, w1_ref, bf1_ref, w2_ref, bf2_ref,
                          g2_ref, be2_ref, o_ref):
    # one batch element per grid step: x (S, D)
    x = x_ref[0]
    D = x.shape[-1]
    # fused QKV projection (single (D, 3D) matmul)
    qkv = jnp.dot(x, wqkv_ref[...], preferred_element_type=jnp.float32) + bqkv_ref[...]
    # TODO(synk): no PAD_IDX padding mask is applied (reference Encoder_Model not given).
    a = _attend(qkv[:, :D], qkv[:, D:2 * D], qkv[:, 2 * D:],
                wo_ref[...], bo_ref[...], None)
    x = _ln(x + a, g1_ref[...], be1_ref[...])
    h = jnp.maximum(
        jnp.dot(x, w1_ref[...], preferred_element_type=jnp.float32) + bf1_ref[...], 0.0)
    f = jnp.dot(h, w2_ref[...], preferred_element_type=jnp.float32) + bf2_ref[...]
    o_ref[0] = _ln(x + f, g2_ref[...], be2_ref[...])


def encoder_layer_fused(p, x):
    """x: (B, S, D) -> (B, S, D).  One pallas_call for the whole layer."""
    B, S, D = x.shape
    w = [p["wqkv"], p["bqkv"], p["wo"], p["bo"], p["ln1_g"], p["ln1_b"],
         p["w1"], p["bf1"], p["w2"], p["bf2"], p["ln2_g"], p["ln2_b"]]
    return pl.pallas_call(
        _encoder_layer_kernel,
        out_shape=jax.ShapeDtypeStruct((B, S, D), jnp.float32),
        grid=(B,),
        in_specs=[pl.BlockSpec((1, S, D), lambda b: (b, 0, 0))]
                 + [pl.BlockSpec(a.shape, lambda b: (0, 0)) for a in w],
        out_specs=pl.BlockSpec((1, S, D), lambda b: (b, 0, 0)),
        compiler_params=pltpu.CompilerParams(dimension_semantics=("parallel",)),
    )(x, *w)


def _decoder_step_kernel(x_ref, enc_ref,
                         wqkv_ref, bqkv_ref, wos_ref, bos_ref, g1_ref, be1_ref,
                         wqc_ref, bqc_ref, wkvc_ref, bkvc_ref, woc_ref, boc_ref,
                         g2_ref, be2_ref,
                         w1_ref, bf1_ref, w2_ref, bf2_ref, g3_ref, be3_ref,
                         wl_ref, bl_ref,
                         logits_ref):
    # one batch element per grid step: x (L, D), enc (S_enc, D)
    x = x_ref[0]
    enc = enc_ref[0]
    L = x.shape[0]
    D = x.shape[-1]

    # causal mask generated in-kernel (no HBM input)
    row = jax.lax.broadcasted_iota(jnp.int32, (L, L), 0)
    col = jax.lax.broadcasted_iota(jnp.int32, (L, L), 1)
    causal = jnp.where(row >= col, 0.0, MASKING_VALUE).astype(jnp.float32)

    # masked self-attention (fused QKV)
    qkv = jnp.dot(x, wqkv_ref[...], preferred_element_type=jnp.float32) + bqkv_ref[...]
    a = _attend(qkv[:, :D], qkv[:, D:2 * D], qkv[:, 2 * D:],
                wos_ref[...], bos_ref[...], causal)
    x = _ln(x + a, g1_ref[...], be1_ref[...])

    # cross-attention (fused KV from encoder output)
    q = jnp.dot(x, wqc_ref[...], preferred_element_type=jnp.float32) + bqc_ref[...]
    kv = jnp.dot(enc, wkvc_ref[...], preferred_element_type=jnp.float32) + bkvc_ref[...]
    c = _attend(q, kv[:, :D], kv[:, D:], woc_ref[...], boc_ref[...], None)
    x = _ln(x + c, g2_ref[...], be2_ref[...])

    # position-wise FFN
    h = jnp.maximum(
        jnp.dot(x, w1_ref[...], preferred_element_type=jnp.float32) + bf1_ref[...], 0.0)
    f = jnp.dot(h, w2_ref[...], preferred_element_type=jnp.float32) + bf2_ref[...]
    x = _ln(x + f, g3_ref[...], be3_ref[...])

    # final vocab projection (padded to 128 lanes -> lane-dense store)
    logits_ref[0] = (jnp.dot(x, wl_ref[...], preferred_element_type=jnp.float32)
                     + bl_ref[...])


def decoder_step_fused(p, lin_w_pad, lin_b_pad, enc_out, dec_emb):
    """dec_emb: (B, L, D), enc_out: (B, S_enc, D) -> padded logits (B, L, VOCAB_PAD).
    One pallas_call per decode step (decoder layer + vocab projection)."""
    B, L, D = dec_emb.shape
    S_enc = enc_out.shape[1]
    w = [p["wqkv"], p["bqkv"], p["wos"], p["bos"], p["ln1_g"], p["ln1_b"],
         p["wqc"], p["bqc"], p["wkvc"], p["bkvc"], p["woc"], p["boc"],
         p["ln2_g"], p["ln2_b"],
         p["w1"], p["bf1"], p["w2"], p["bf2"], p["ln3_g"], p["ln3_b"],
         lin_w_pad, lin_b_pad]
    return pl.pallas_call(
        _decoder_step_kernel,
        out_shape=jax.ShapeDtypeStruct((B, L, VOCAB_PAD), jnp.float32),
        grid=(B,),
        in_specs=[pl.BlockSpec((1, L, D), lambda b: (b, 0, 0)),
                  pl.BlockSpec((1, S_enc, D), lambda b: (b, 0, 0))]
                 + [pl.BlockSpec(a.shape, lambda b: (0, 0)) for a in w],
        out_specs=pl.BlockSpec((1, L, VOCAB_PAD), lambda b: (b, 0, 0)),
        compiler_params=pltpu.CompilerParams(dimension_semantics=("parallel",)),
    )(dec_emb, enc_out, *w)

# =========================== embedding (XLA glue) ===========================

def sinusoidal_pos(max_len, d_model):
    pos = jnp.arange(max_len, dtype=jnp.float32)[:, None]
    i = jnp.arange(d_model // 2, dtype=jnp.float32)[None, :]
    angle = pos / jnp.power(10000.0, 2.0 * i / d_model)
    pe = jnp.zeros((max_len, d_model), jnp.float32)
    pe = pe.at[:, 0::2].set(jnp.sin(angle))
    pe = pe.at[:, 1::2].set(jnp.cos(angle))
    return pe


def embed(emb_p, tokens):
    # nn.Embedding(padding_idx=pad_idx): pad row zeroed at init.
    S = tokens.shape[1]
    e = jnp.take(emb_p["table"], tokens, axis=0) * math.sqrt(D_MODEL)
    return e + emb_p["pos"][:S][None, :, :]

# ============================ parameter init ================================

def init_params(key):
    keys = iter(jax.random.split(key, 64))

    def dense(fan_in, fan_out):
        w = 0.02 * jax.random.normal(next(keys), (fan_in, fan_out), jnp.float32)
        b = jnp.zeros((1, fan_out), jnp.float32)
        return w, b

    def ln():
        return (jnp.ones((1, D_MODEL), jnp.float32),
                jnp.zeros((1, D_MODEL), jnp.float32))

    def enc_layer():
        wqkv, bqkv = dense(D_MODEL, 3 * D_MODEL)      # fused Q|K|V
        wo, bo = dense(D_MODEL, D_MODEL)
        w1, bf1 = dense(D_MODEL, D_FF)
        w2, bf2 = dense(D_FF, D_MODEL)
        g1, be1 = ln(); g2, be2 = ln()
        return dict(wqkv=wqkv, bqkv=bqkv, wo=wo, bo=bo, w1=w1, bf1=bf1,
                    w2=w2, bf2=bf2, ln1_g=g1, ln1_b=be1, ln2_g=g2, ln2_b=be2)

    def dec_layer():
        wqkv, bqkv = dense(D_MODEL, 3 * D_MODEL)      # fused self Q|K|V
        wos, bos = dense(D_MODEL, D_MODEL)
        wqc, bqc = dense(D_MODEL, D_MODEL)            # cross Q
        wkvc, bkvc = dense(D_MODEL, 2 * D_MODEL)      # fused cross K|V
        woc, boc = dense(D_MODEL, D_MODEL)
        w1, bf1 = dense(D_MODEL, D_FF)
        w2, bf2 = dense(D_FF, D_MODEL)
        g1, be1 = ln(); g2, be2 = ln(); g3, be3 = ln()
        return dict(wqkv=wqkv, bqkv=bqkv, wos=wos, bos=bos,
                    wqc=wqc, bqc=bqc, wkvc=wkvc, bkvc=bkvc, woc=woc, boc=boc,
                    w1=w1, bf1=bf1, w2=w2, bf2=bf2,
                    ln1_g=g1, ln1_b=be1, ln2_g=g2, ln2_b=be2, ln3_g=g3, ln3_b=be3)

    def embedding_params(vocab, max_len):
        table = 0.02 * jax.random.normal(next(keys), (vocab, D_MODEL), jnp.float32)
        table = table.at[PAD_IDX].set(0.0)            # padding_idx row = 0
        return dict(table=table, pos=sinusoidal_pos(max_len, D_MODEL))

    lw, lb = dense(D_MODEL, VOCAB_DEC)
    lin_w_pad = jnp.zeros((D_MODEL, VOCAB_PAD), jnp.float32).at[:, :VOCAB_DEC].set(lw)
    lin_b_pad = jnp.zeros((1, VOCAB_PAD), jnp.float32).at[:, :VOCAB_DEC].set(lb[0])

    return dict(
        enc_emb=embedding_params(VOCAB_ENC, MAX_LEN_ENC),
        dec_emb=embedding_params(VOCAB_DEC, MAX_LEN_DEC),
        encoder=[enc_layer() for _ in range(NX)],
        decoder=[dec_layer() for _ in range(NX)],
        lin_w_pad=lin_w_pad, lin_b_pad=lin_b_pad,
    )

# ======================== forward (reference semantics) =====================

def _decode_loop(params, enc_out, decoder_target):
    """Greedy (decoder_target=None) or teacher-forced decode, fully on device."""
    dec_p = params["decoder"][-1]   # reference loops are unchained: only last layer matters
    B = enc_out.shape[0]
    L = MAX_LEN_DEC
    tokens0 = jnp.ones((B, L), jnp.int32)            # start token = 1; filler is harmless (causal)
    out0 = jnp.zeros((B, L, VOCAB_DEC), jnp.float32)

    def cond(carry):
        step, tokens, stop, out = carry
        return jnp.logical_and(step < L - 1, stop != B)

    def body(carry):
        step, tokens, stop, out = carry
        dec_embed = embed(params["dec_emb"], tokens)                       # (B, L, D)
        logits_pad = decoder_step_fused(dec_p, params["lin_w_pad"],
                                        params["lin_b_pad"], enc_out, dec_embed)
        logits = logits_pad[:, :, :VOCAB_DEC]                              # (B, L, V)
        if decoder_target is None:
            cur = jax.lax.dynamic_slice_in_dim(logits, step, 1, axis=1)[:, 0, :]
            nxt = jnp.argmax(cur, axis=-1).astype(jnp.int32)               # argmax(softmax)==argmax
        else:
            nxt = jax.lax.dynamic_slice_in_dim(
                decoder_target, step, 1, axis=1)[:, 0].astype(jnp.int32)
        tokens = jax.lax.dynamic_update_slice(tokens, nxt[:, None],
                                              (jnp.int32(0), step + 1))
        stop = stop + jnp.sum((nxt == STOP_TOKEN).astype(jnp.int32))
        return (step + 1, tokens, stop, logits)

    step_f, _, _, out_f = jax.lax.while_loop(
        cond, body, (jnp.int32(0), tokens0, jnp.int32(0), out0))
    # Reference returns the step index at which it stopped.
    return out_f, step_f - 1


@jax.jit
def _forward_greedy(params, encoder_input):
    enc_embed = embed(params["enc_emb"], encoder_input)
    # Reference ModuleList loop is NOT chained -> only the last layer's output
    # is used; running only it is bit-identical and skips dead compute.
    enc_out = encoder_layer_fused(params["encoder"][-1], enc_embed)
    return _decode_loop(params, enc_out, None)


@jax.jit
def _forward_teacher(params, encoder_input, decoder_target):
    enc_embed = embed(params["enc_emb"], encoder_input)
    enc_out = encoder_layer_fused(params["encoder"][-1], enc_embed)
    return _decode_loop(params, enc_out, decoder_target)


def transformer_forward(params, encoder_input, decoder_target=None):
    if decoder_target is None:
        return _forward_greedy(params, encoder_input)
    return _forward_teacher(params, encoder_input, decoder_target)

# =================================== main ===================================

if __name__ == "__main__":
    key = jax.random.PRNGKey(0)
    pkey, dkey = jax.random.split(key)
    params = init_params(pkey)

    encoder_input = jax.random.randint(
        dkey, (BATCH, MAX_LEN_ENC), minval=3, maxval=VOCAB_ENC, dtype=jnp.int32)

    out, step = transformer_forward(params, encoder_input, decoder_target=None)
    jax.block_until_ready(out)
    assert out.shape[0] == BATCH and out.shape[-1] == VOCAB_DEC
    assert out.shape[1] == MAX_LEN_DEC
    print("KERNEL_OK")
</pallas_src>

<mosaic_0001>
module attributes {stable_mosaic.version = 11 : i64} {
  func.func @_encoder_layer_kernel(%arg0: i32, %arg1: memref<1x8x32xf32, #tpu.memory_space<vmem>>, %arg2: memref<32x96xf32, #tpu.memory_space<vmem>>, %arg3: memref<1x96xf32, #tpu.memory_space<vmem>>, %arg4: memref<32x32xf32, #tpu.memory_space<vmem>>, %arg5: memref<1x32xf32, #tpu.memory_space<vmem>>, %arg6: memref<1x32xf32, #tpu.memory_space<vmem>>, %arg7: memref<1x32xf32, #tpu.memory_space<vmem>>, %arg8: memref<32x64xf32, #tpu.memory_space<vmem>>, %arg9: memref<1x64xf32, #tpu.memory_space<vmem>>, %arg10: memref<64x32xf32, #tpu.memory_space<vmem>>, %arg11: memref<1x32xf32, #tpu.memory_space<vmem>>, %arg12: memref<1x32xf32, #tpu.memory_space<vmem>>, %arg13: memref<1x32xf32, #tpu.memory_space<vmem>>, %arg14: memref<1x8x32xf32, #tpu.memory_space<vmem>>) attributes {dimension_semantics = [#tpu.dimension_semantics<parallel>], iteration_bounds = array<i64: 2>, scalar_prefetch = 0 : i64, scratch_operands = 0 : i64, tpu.core_type = #tpu.core_type<tc>, window_params = [{transform_indices = @transform_0, window_bounds = array<i64: 1, 8, 32>}, {pipeline_mode = #tpu.pipeline_mode<synchronous>, transform_indices = @transform_1, window_bounds = array<i64: 32, 96>}, {pipeline_mode = #tpu.pipeline_mode<synchronous>, transform_indices = @transform_2, window_bounds = array<i64: 1, 96>}, {pipeline_mode = #tpu.pipeline_mode<synchronous>, transform_indices = @transform_3, window_bounds = array<i64: 32, 32>}, {pipeline_mode = #tpu.pipeline_mode<synchronous>, transform_indices = @transform_4, window_bounds = array<i64: 1, 32>}, {pipeline_mode = #tpu.pipeline_mode<synchronous>, transform_indices = @transform_5, window_bounds = array<i64: 1, 32>}, {pipeline_mode = #tpu.pipeline_mode<synchronous>, transform_indices = @transform_6, window_bounds = array<i64: 1, 32>}, {pipeline_mode = #tpu.pipeline_mode<synchronous>, transform_indices = @transform_7, window_bounds = array<i64: 32, 64>}, {pipeline_mode = #tpu.pipeline_mode<synchronous>, transform_indices = @transform_8, window_bounds = array<i64: 1, 64>}, {pipeline_mode = #tpu.pipeline_mode<synchronous>, transform_indices = @transform_9, window_bounds = array<i64: 64, 32>}, {pipeline_mode = #tpu.pipeline_mode<synchronous>, transform_indices = @transform_10, window_bounds = array<i64: 1, 32>}, {pipeline_mode = #tpu.pipeline_mode<synchronous>, transform_indices = @transform_11, window_bounds = array<i64: 1, 32>}, {pipeline_mode = #tpu.pipeline_mode<synchronous>, transform_indices = @transform_12, window_bounds = array<i64: 1, 32>}, {transform_indices = @transform_13, window_bounds = array<i64: 1, 8, 32>}]} {
    %c0 = arith.constant 0 : index
    %c0_0 = arith.constant 0 : index
    %c0_1 = arith.constant 0 : index
    %0 = vector.load %arg1[%c0, %c0_0, %c0_1] : memref<1x8x32xf32, #tpu.memory_space<vmem>>, vector<1x8x32xf32>
    %1 = vector.shape_cast %0 : vector<1x8x32xf32> to vector<8x32xf32>
    %c0_2 = arith.constant 0 : index
    %c0_3 = arith.constant 0 : index
    %2 = vector.load %arg2[%c0_2, %c0_3] : memref<32x96xf32, #tpu.memory_space<vmem>>, vector<32x96xf32>
    %cst = arith.constant dense<0.000000e+00> : vector<8x96xf32>
    %3 = tpu.matmul %1, %2, %cst {dimension_numbers = #tpu.dot_dimension_numbers<[1], [0], [0], [1], [0, 0, 1, 1], [], []>} : vector<8x32xf32>, vector<32x96xf32>, vector<8x96xf32> -> vector<8x96xf32>
    %c0_4 = arith.constant 0 : index
    %c0_5 = arith.constant 0 : index
    %4 = vector.load %arg3[%c0_4, %c0_5] : memref<1x96xf32, #tpu.memory_space<vmem>>, vector<1x96xf32>
    %5 = vector.broadcast %4 : vector<1x96xf32> to vector<8x96xf32>
    %6 = arith.addf %3, %5 : vector<8x96xf32>
    %7 = vector.extract_strided_slice %6 {offsets = [0, 0], sizes = [8, 32], strides = [1, 1]} : vector<8x96xf32> to vector<8x32xf32>
    %8 = vector.extract_strided_slice %6 {offsets = [0, 32], sizes = [8, 32], strides = [1, 1]} : vector<8x96xf32> to vector<8x32xf32>
    %9 = vector.extract_strided_slice %6 {offsets = [0, 64], sizes = [8, 32], strides = [1, 1]} : vector<8x96xf32> to vector<8x32xf32>
    %c0_6 = arith.constant 0 : index
    %c0_7 = arith.constant 0 : index
    %10 = vector.load %arg4[%c0_6, %c0_7] : memref<32x32xf32, #tpu.memory_space<vmem>>, vector<32x32xf32>
    %c0_8 = arith.constant 0 : index
    %c0_9 = arith.constant 0 : index
    %11 = vector.load %arg5[%c0_8, %c0_9] : memref<1x32xf32, #tpu.memory_space<vmem>>, vector<1x32xf32>
    %cst_10 = arith.constant 0.000000e+00 : f32
    %12 = vector.broadcast %cst_10 : f32 to vector<8x32xf32>
    %13 = vector.extract_strided_slice %7 {offsets = [0, 0], sizes = [8, 8], strides = [1, 1]} : vector<8x32xf32> to vector<8x8xf32>
    %14 = vector.extract_strided_slice %8 {offsets = [0, 0], sizes = [8, 8], strides = [1, 1]} : vector<8x32xf32> to vector<8x8xf32>
    %15 = vector.extract_strided_slice %9 {offsets = [0, 0], sizes = [8, 8], strides = [1, 1]} : vector<8x32xf32> to vector<8x8xf32>
    %cst_11 = arith.constant dense<0.000000e+00> : vector<8x8xf32>
    %16 = tpu.matmul %13, %14, %cst_11 {dimension_numbers = #tpu.dot_dimension_numbers<[1], [1], [0], [0], [0, 0, 1, 0], [], []>} : vector<8x8xf32>, vector<8x8xf32>, vector<8x8xf32> -> vector<8x8xf32>
    %cst_12 = arith.constant 0.353553385 : f32
    %17 = vector.broadcast %cst_12 : f32 to vector<8x8xf32>
    %18 = arith.mulf %16, %17 : vector<8x8xf32>
    %cst_13 = arith.constant dense<0xFF800000> : vector<8xf32>
    %19 = vector.multi_reduction <maximumf>, %18, %cst_13 [1] : vector<8x8xf32> to vector<8xf32>
    %20 = vector.shape_cast %19 : vector<8xf32> to vector<8x1xf32>
    %21 = vector.broadcast %20 : vector<8x1xf32> to vector<8x8xf32>
    %22 = arith.subf %18, %21 : vector<8x8xf32>
    %23 = math.exp %22 : vector<8x8xf32>
    %cst_14 = arith.constant dense<0.000000e+00> : vector<8xf32>
    %24 = vector.multi_reduction <add>, %23, %cst_14 [1] : vector<8x8xf32> to vector<8xf32>
    %25 = vector.shape_cast %24 : vector<8xf32> to vector<8x1xf32>
    %26 = vector.broadcast %25 : vector<8x1xf32> to vector<8x8xf32>
    %27 = arith.divf %23, %26 : vector<8x8xf32>
    %cst_15 = arith.constant dense<0.000000e+00> : vector<8x8xf32>
    %28 = tpu.matmul %27, %15, %cst_15 {dimension_numbers = #tpu.dot_dimension_numbers<[1], [0], [0], [1], [0, 0, 1, 1], [], []>} : vector<8x8xf32>, vector<8x8xf32>, vector<8x8xf32> -> vector<8x8xf32>
    %29 = vector.extract_strided_slice %10 {offsets = [0, 0], sizes = [8, 32], strides = [1, 1]} : vector<32x32xf32> to vector<8x32xf32>
    %cst_16 = arith.constant dense<0.000000e+00> : vector<8x32xf32>
    %30 = tpu.matmul %28, %29, %cst_16 {dimension_numbers = #tpu.dot_dimension_numbers<[1], [0], [0], [1], [0, 0, 1, 1], [], []>} : vector<8x8xf32>, vector<8x32xf32>, vector<8x32xf32> -> vector<8x32xf32>
    %31 = arith.addf %12, %30 : vector<8x32xf32>
    %32 = vector.extract_strided_slice %7 {offsets = [0, 8], sizes = [8, 8], strides = [1, 1]} : vector<8x32xf32> to vector<8x8xf32>
    %33 = vector.extract_strided_slice %8 {offsets = [0, 8], sizes = [8, 8], strides = [1, 1]} : vector<8x32xf32> to vector<8x8xf32>
    %34 = vector.extract_strided_slice %9 {offsets = [0, 8], sizes = [8, 8], strides = [1, 1]} : vector<8x32xf32> to vector<8x8xf32>
    %cst_17 = arith.constant dense<0.000000e+00> : vector<8x8xf32>
    %35 = tpu.matmul %32, %33, %cst_17 {dimension_numbers = #tpu.dot_dimension_numbers<[1], [1], [0], [0], [0, 0, 1, 0], [], []>} : vector<8x8xf32>, vector<8x8xf32>, vector<8x8xf32> -> vector<8x8xf32>
    %cst_18 = arith.constant 0.353553385 : f32
    %36 = vector.broadcast %cst_18 : f32 to vector<8x8xf32>
    %37 = arith.mulf %35, %36 : vector<8x8xf32>
    %cst_19 = arith.constant dense<0xFF800000> : vector<8xf32>
    %38 = vector.multi_reduction <maximumf>, %37, %cst_19 [1] : vector<8x8xf32> to vector<8xf32>
    %39 = vector.shape_cast %38 : vector<8xf32> to vector<8x1xf32>
    %40 = vector.broadcast %39 : vector<8x1xf32> to vector<8x8xf32>
    %41 = arith.subf %37, %40 : vector<8x8xf32>
    %42 = math.exp %41 : vector<8x8xf32>
    %cst_20 = arith.constant dense<0.000000e+00> : vector<8xf32>
    %43 = vector.multi_reduction <add>, %42, %cst_20 [1] : vector<8x8xf32> to vector<8xf32>
    %44 = vector.shape_cast %43 : vector<8xf32> to vector<8x1xf32>
    %45 = vector.broadcast %44 : vector<8x1xf32> to vector<8x8xf32>
    %46 = arith.divf %42, %45 : vector<8x8xf32>
    %cst_21 = arith.constant dense<0.000000e+00> : vector<8x8xf32>
    %47 = tpu.matmul %46, %34, %cst_21 {dimension_numbers = #tpu.dot_dimension_numbers<[1], [0], [0], [1], [0, 0, 1, 1], [], []>} : vector<8x8xf32>, vector<8x8xf32>, vector<8x8xf32> -> vector<8x8xf32>
    %48 = vector.extract_strided_slice %10 {offsets = [8, 0], sizes = [8, 32], strides = [1, 1]} : vector<32x32xf32> to vector<8x32xf32>
    %cst_22 = arith.constant dense<0.000000e+00> : vector<8x32xf32>
    %49 = tpu.matmul %47, %48, %cst_22 {dimension_numbers = #tpu.dot_dimension_numbers<[1], [0], [0], [1], [0, 0, 1, 1], [], []>} : vector<8x8xf32>, vector<8x32xf32>, vector<8x32xf32> -> vector<8x32xf32>
    %50 = arith.addf %31, %49 : vector<8x32xf32>
    %51 = vector.extract_strided_slice %7 {offsets = [0, 16], sizes = [8, 8], strides = [1, 1]} : vector<8x32xf32> to vector<8x8xf32>
    %52 = vector.extract_strided_slice %8 {offsets = [0, 16], sizes = [8, 8], strides = [1, 1]} : vector<8x32xf32> to vector<8x8xf32>
    %53 = vector.extract_strided_slice %9 {offsets = [0, 16], sizes = [8, 8], strides = [1, 1]} : vector<8x32xf32> to vector<8x8xf32>
    %cst_23 = arith.constant dense<0.000000e+00> : vector<8x8xf32>
    %54 = tpu.matmul %51, %52, %cst_23 {dimension_numbers = #tpu.dot_dimension_numbers<[1], [1], [0], [0], [0, 0, 1, 0], [], []>} : vector<8x8xf32>, vector<8x8xf32>, vector<8x8xf32> -> vector<8x8xf32>
    %cst_24 = arith.constant 0.353553385 : f32
    %55 = vector.broadcast %cst_24 : f32 to vector<8x8xf32>
    %56 = arith.mulf %54, %55 : vector<8x8xf32>
    %cst_25 = arith.constant dense<0xFF800000> : vector<8xf32>
    %57 = vector.multi_reduction <maximumf>, %56, %cst_25 [1] : vector<8x8xf32> to vector<8xf32>
    %58 = vector.shape_cast %57 : vector<8xf32> to vector<8x1xf32>
    %59 = vector.broadcast %58 : vector<8x1xf32> to vector<8x8xf32>
    %60 = arith.subf %56, %59 : vector<8x8xf32>
    %61 = math.exp %60 : vector<8x8xf32>
    %cst_26 = arith.constant dense<0.000000e+00> : vector<8xf32>
    %62 = vector.multi_reduction <add>, %61, %cst_26 [1] : vector<8x8xf32> to vector<8xf32>
    %63 = vector.shape_cast %62 : vector<8xf32> to vector<8x1xf32>
    %64 = vector.broadcast %63 : vector<8x1xf32> to vector<8x8xf32>
    %65 = arith.divf %61, %64 : vector<8x8xf32>
    %cst_27 = arith.constant dense<0.000000e+00> : vector<8x8xf32>
    %66 = tpu.matmul %65, %53, %cst_27 {dimension_numbers = #tpu.dot_dimension_numbers<[1], [0], [0], [1], [0, 0, 1, 1], [], []>} : vector<8x8xf32>, vector<8x8xf32>, vector<8x8xf32> -> vector<8x8xf32>
    %67 = vector.extract_strided_slice %10 {offsets = [16, 0], sizes = [8, 32], strides = [1, 1]} : vector<32x32xf32> to vector<8x32xf32>
    %cst_28 = arith.constant dense<0.000000e+00> : vector<8x32xf32>
    %68 = tpu.matmul %66, %67, %cst_28 {dimension_numbers = #tpu.dot_dimension_numbers<[1], [0], [0], [1], [0, 0, 1, 1], [], []>} : vector<8x8xf32>, vector<8x32xf32>, vector<8x32xf32> -> vector<8x32xf32>
    %69 = arith.addf %50, %68 : vector<8x32xf32>
    %70 = vector.extract_strided_slice %7 {offsets = [0, 24], sizes = [8, 8], strides = [1, 1]} : vector<8x32xf32> to vector<8x8xf32>
    %71 = vector.extract_strided_slice %8 {offsets = [0, 24], sizes = [8, 8], strides = [1, 1]} : vector<8x32xf32> to vector<8x8xf32>
    %72 = vector.extract_strided_slice %9 {offsets = [0, 24], sizes = [8, 8], strides = [1, 1]} : vector<8x32xf32> to vector<8x8xf32>
    %cst_29 = arith.constant dense<0.000000e+00> : vector<8x8xf32>
    %73 = tpu.matmul %70, %71, %cst_29 {dimension_numbers = #tpu.dot_dimension_numbers<[1], [1], [0], [0], [0, 0, 1, 0], [], []>} : vector<8x8xf32>, vector<8x8xf32>, vector<8x8xf32> -> vector<8x8xf32>
    %cst_30 = arith.constant 0.353553385 : f32
    %74 = vector.broadcast %cst_30 : f32 to vector<8x8xf32>
    %75 = arith.mulf %73, %74 : vector<8x8xf32>
    %cst_31 = arith.constant dense<0xFF800000> : vector<8xf32>
    %76 = vector.multi_reduction <maximumf>, %75, %cst_31 [1] : vector<8x8xf32> to vector<8xf32>
    %77 = vector.shape_cast %76 : vector<8xf32> to vector<8x1xf32>
    %78 = vector.broadcast %77 : vector<8x1xf32> to vector<8x8xf32>
    %79 = arith.subf %75, %78 : vector<8x8xf32>
    %80 = math.exp %79 : vector<8x8xf32>
    %cst_32 = arith.constant dense<0.000000e+00> : vector<8xf32>
    %81 = vector.multi_reduction <add>, %80, %cst_32 [1] : vector<8x8xf32> to vector<8xf32>
    %82 = vector.shape_cast %81 : vector<8xf32> to vector<8x1xf32>
    %83 = vector.broadcast %82 : vector<8x1xf32> to vector<8x8xf32>
    %84 = arith.divf %80, %83 : vector<8x8xf32>
    %cst_33 = arith.constant dense<0.000000e+00> : vector<8x8xf32>
    %85 = tpu.matmul %84, %72, %cst_33 {dimension_numbers = #tpu.dot_dimension_numbers<[1], [0], [0], [1], [0, 0, 1, 1], [], []>} : vector<8x8xf32>, vector<8x8xf32>, vector<8x8xf32> -> vector<8x8xf32>
    %86 = vector.extract_strided_slice %10 {offsets = [24, 0], sizes = [8, 32], strides = [1, 1]} : vector<32x32xf32> to vector<8x32xf32>
    %cst_34 = arith.constant dense<0.000000e+00> : vector<8x32xf32>
    %87 = tpu.matmul %85, %86, %cst_34 {dimension_numbers = #tpu.dot_dimension_numbers<[1], [0], [0], [1], [0, 0, 1, 1], [], []>} : vector<8x8xf32>, vector<8x32xf32>, vector<8x32xf32> -> vector<8x32xf32>
    %88 = arith.addf %69, %87 : vector<8x32xf32>
    %89 = vector.broadcast %11 : vector<1x32xf32> to vector<8x32xf32>
    %90 = arith.addf %88, %89 : vector<8x32xf32>
    %91 = arith.addf %1, %90 : vector<8x32xf32>
    %c0_35 = arith.constant 0 : index
    %c0_36 = arith.constant 0 : index
    %92 = vector.load %arg6[%c0_35, %c0_36] : memref<1x32xf32, #tpu.memory_space<vmem>>, vector<1x32xf32>
    %c0_37 = arith.constant 0 : index
    %c0_38 = arith.constant 0 : index
    %93 = vector.load %arg7[%c0_37, %c0_38] : memref<1x32xf32, #tpu.memory_space<vmem>>, vector<1x32xf32>
    %cst_39 = arith.constant dense<0.000000e+00> : vector<8xf32>
    %94 = vector.multi_reduction <add>, %91, %cst_39 [1] : vector<8x32xf32> to vector<8xf32>
    %95 = vector.shape_cast %94 : vector<8xf32> to vector<8x1xf32>
    %cst_40 = arith.constant 3.200000e+01 : f32
    %96 = vector.broadcast %cst_40 : f32 to vector<8x1xf32>
    %97 = arith.divf %95, %96 : vector<8x1xf32>
    %98 = vector.broadcast %97 : vector<8x1xf32> to vector<8x32xf32>
    %99 = arith.subf %91, %98 : vector<8x32xf32>
    %100 = arith.mulf %99, %99 : vector<8x32xf32>
    %cst_41 = arith.constant dense<0.000000e+00> : vector<8xf32>
    %101 = vector.multi_reduction <add>, %100, %cst_41 [1] : vector<8x32xf32> to vector<8xf32>
    %102 = vector.shape_cast %101 : vector<8xf32> to vector<8x1xf32>
    %cst_42 = arith.constant 3.200000e+01 : f32
    %103 = vector.broadcast %cst_42 : f32 to vector<8x1xf32>
    %104 = arith.divf %102, %103 : vector<8x1xf32>
    %105 = vector.broadcast %97 : vector<8x1xf32> to vector<8x32xf32>
    %106 = arith.subf %91, %105 : vector<8x32xf32>
    %cst_43 = arith.constant 9.99999974E-6 : f32
    %107 = vector.broadcast %cst_43 : f32 to vector<8x1xf32>
    %108 = arith.addf %104, %107 : vector<8x1xf32>
    %109 = math.rsqrt %108 : vector<8x1xf32>
    %110 = vector.broadcast %109 : vector<8x1xf32> to vector<8x32xf32>
    %111 = arith.mulf %106, %110 : vector<8x32xf32>
    %112 = vector.broadcast %92 : vector<1x32xf32> to vector<8x32xf32>
    %113 = arith.mulf %111, %112 : vector<8x32xf32>
    %114 = vector.broadcast %93 : vector<1x32xf32> to vector<8x32xf32>
    %115 = arith.addf %113, %114 : vector<8x32xf32>
    %c0_44 = arith.constant 0 : index
    %c0_45 = arith.constant 0 : index
    %116 = vector.load %arg8[%c0_44, %c0_45] : memref<32x64xf32, #tpu.memory_space<vmem>>, vector<32x64xf32>
    %cst_46 = arith.constant dense<0.000000e+00> : vector<8x64xf32>
    %117 = tpu.matmul %115, %116, %cst_46 {dimension_numbers = #tpu.dot_dimension_numbers<[1], [0], [0], [1], [0, 0, 1, 1], [], []>} : vector<8x32xf32>, vector<32x64xf32>, vector<8x64xf32> -> vector<8x64xf32>
    %c0_47 = arith.constant 0 : index
    %c0_48 = arith.constant 0 : index
    %118 = vector.load %arg9[%c0_47, %c0_48] : memref<1x64xf32, #tpu.memory_space<vmem>>, vector<1x64xf32>
    %119 = vector.broadcast %118 : vector<1x64xf32> to vector<8x64xf32>
    %120 = arith.addf %117, %119 : vector<8x64xf32>
    %cst_49 = arith.constant 0.000000e+00 : f32
    %121 = vector.broadcast %cst_49 : f32 to vector<8x64xf32>
    %122 = arith.maximumf %120, %121 : vector<8x64xf32>
    %c0_50 = arith.constant 0 : index
    %c0_51 = arith.constant 0 : index
    %123 = vector.load %arg10[%c0_50, %c0_51] : memref<64x32xf32, #tpu.memory_space<vmem>>, vector<64x32xf32>
    %cst_52 = arith.constant dense<0.000000e+00> : vector<8x32xf32>
    %124 = tpu.matmul %122, %123, %cst_52 {dimension_numbers = #tpu.dot_dimension_numbers<[1], [0], [0], [1], [0, 0, 1, 1], [], []>} : vector<8x64xf32>, vector<64x32xf32>, vector<8x32xf32> -> vector<8x32xf32>
    %c0_53 = arith.constant 0 : index
    %c0_54 = arith.constant 0 : index
    %125 = vector.load %arg11[%c0_53, %c0_54] : memref<1x32xf32, #tpu.memory_space<vmem>>, vector<1x32xf32>
    %126 = vector.broadcast %125 : vector<1x32xf32> to vector<8x32xf32>
    %127 = arith.addf %124, %126 : vector<8x32xf32>
    %128 = arith.addf %115, %127 : vector<8x32xf32>
    %c0_55 = arith.constant 0 : index
    %c0_56 = arith.constant 0 : index
    %129 = vector.load %arg12[%c0_55, %c0_56] : memref<1x32xf32, #tpu.memory_space<vmem>>, vector<1x32xf32>
    %c0_57 = arith.constant 0 : index
    %c0_58 = arith.constant 0 : index
    %130 = vector.load %arg13[%c0_57, %c0_58] : memref<1x32xf32, #tpu.memory_space<vmem>>, vector<1x32xf32>
    %cst_59 = arith.constant dense<0.000000e+00> : vector<8xf32>
    %131 = vector.multi_reduction <add>, %128, %cst_59 [1] : vector<8x32xf32> to vector<8xf32>
    %132 = vector.shape_cast %131 : vector<8xf32> to vector<8x1xf32>
    %cst_60 = arith.constant 3.200000e+01 : f32
    %133 = vector.broadcast %cst_60 : f32 to vector<8x1xf32>
    %134 = arith.divf %132, %133 : vector<8x1xf32>
    %135 = vector.broadcast %134 : vector<8x1xf32> to vector<8x32xf32>
    %136 = arith.subf %128, %135 : vector<8x32xf32>
    %137 = arith.mulf %136, %136 : vector<8x32xf32>
    %cst_61 = arith.constant dense<0.000000e+00> : vector<8xf32>
    %138 = vector.multi_reduction <add>, %137, %cst_61 [1] : vector<8x32xf32> to vector<8xf32>
    %139 = vector.shape_cast %138 : vector<8xf32> to vector<8x1xf32>
    %cst_62 = arith.constant 3.200000e+01 : f32
    %140 = vector.broadcast %cst_62 : f32 to vector<8x1xf32>
    %141 = arith.divf %139, %140 : vector<8x1xf32>
    %142 = vector.broadcast %134 : vector<8x1xf32> to vector<8x32xf32>
    %143 = arith.subf %128, %142 : vector<8x32xf32>
    %cst_63 = arith.constant 9.99999974E-6 : f32
    %144 = vector.broadcast %cst_63 : f32 to vector<8x1xf32>
    %145 = arith.addf %141, %144 : vector<8x1xf32>
    %146 = math.rsqrt %145 : vector<8x1xf32>
    %147 = vector.broadcast %146 : vector<8x1xf32> to vector<8x32xf32>
    %148 = arith.mulf %143, %147 : vector<8x32xf32>
    %149 = vector.broadcast %129 : vector<1x32xf32> to vector<8x32xf32>
    %150 = arith.mulf %148, %149 : vector<8x32xf32>
    %151 = vector.broadcast %130 : vector<1x32xf32> to vector<8x32xf32>
    %152 = arith.addf %150, %151 : vector<8x32xf32>
    %c0_64 = arith.constant 0 : index
    %c0_65 = arith.constant 0 : index
    %c0_66 = arith.constant 0 : index
    %153 = vector.load %arg14[%c0_64, %c0_65, %c0_66] : memref<1x8x32xf32, #tpu.memory_space<vmem>>, vector<1x8x32xf32>
    %154 = vector.shape_cast %153 : vector<1x8x32xf32> to vector<8x32xf32>
    %155 = vector.shape_cast %152 : vector<8x32xf32> to vector<1x8x32xf32>
    tpu.vector_store %arg14[%c0_64, %c0_65, %c0_66], %155 {strides = array<i32>} : memref<1x8x32xf32, #tpu.memory_space<vmem>>, vector<1x8x32xf32>,
    return
  }
  func.func @transform_0(%arg0: i32) -> (i32, i32, i32) {
    %c0_i32 = arith.constant 0 : i32
    %c0_i32_0 = arith.constant 0 : i32
    %c0_i32_1 = arith.constant 0 : i32
    return %arg0, %c0_i32, %c0_i32_0 : i32, i32, i32
  }
  func.func @transform_1(%arg0: i32) -> (i32, i32) {
    %c0_i32 = arith.constant 0 : i32
    %c0_i32_0 = arith.constant 0 : i32
    %c0_i32_1 = arith.constant 0 : i32
    return %c0_i32, %c0_i32_0 : i32, i32
  }
  func.func @transform_2(%arg0: i32) -> (i32, i32) {
    %c0_i32 = arith.constant 0 : i32
    %c0_i32_0 = arith.constant 0 : i32
    %c0_i32_1 = arith.constant 0 : i32
    return %c0_i32, %c0_i32_0 : i32, i32
  }
  func.func @transform_3(%arg0: i32) -> (i32, i32) {
    %c0_i32 = arith.constant 0 : i32
    %c0_i32_0 = arith.constant 0 : i32
    %c0_i32_1 = arith.constant 0 : i32
    return %c0_i32, %c0_i32_0 : i32, i32
  }
  func.func @transform_4(%arg0: i32) -> (i32, i32) {
    %c0_i32 = arith.constant 0 : i32
    %c0_i32_0 = arith.constant 0 : i32
    %c0_i32_1 = arith.constant 0 : i32
    return %c0_i32, %c0_i32_0 : i32, i32
  }
  func.func @transform_5(%arg0: i32) -> (i32, i32) {
    %c0_i32 = arith.constant 0 : i32
    %c0_i32_0 = arith.constant 0 : i32
    %c0_i32_1 = arith.constant 0 : i32
    return %c0_i32, %c0_i32_0 : i32, i32
  }
  func.func @transform_6(%arg0: i32) -> (i32, i32) {
    %c0_i32 = arith.constant 0 : i32
    %c0_i32_0 = arith.constant 0 : i32
    %c0_i32_1 = arith.constant 0 : i32
    return %c0_i32, %c0_i32_0 : i32, i32
  }
  func.func @transform_7(%arg0: i32) -> (i32, i32) {
    %c0_i32 = arith.constant 0 : i32
    %c0_i32_0 = arith.constant 0 : i32
    %c0_i32_1 = arith.constant 0 : i32
    return %c0_i32, %c0_i32_0 : i32, i32
  }
  func.func @transform_8(%arg0: i32) -> (i32, i32) {
    %c0_i32 = arith.constant 0 : i32
    %c0_i32_0 = arith.constant 0 : i32
    %c0_i32_1 = arith.constant 0 : i32
    return %c0_i32, %c0_i32_0 : i32, i32
  }
  func.func @transform_9(%arg0: i32) -> (i32, i32) {
    %c0_i32 = arith.constant 0 : i32
    %c0_i32_0 = arith.constant 0 : i32
    %c0_i32_1 = arith.constant 0 : i32
    return %c0_i32, %c0_i32_0 : i32, i32
  }
  func.func @transform_10(%arg0: i32) -> (i32, i32) {
    %c0_i32 = arith.constant 0 : i32
    %c0_i32_0 = arith.constant 0 : i32
    %c0_i32_1 = arith.constant 0 : i32
    return %c0_i32, %c0_i32_0 : i32, i32
  }
  func.func @transform_11(%arg0: i32) -> (i32, i32) {
    %c0_i32 = arith.constant 0 : i32
    %c0_i32_0 = arith.constant 0 : i32
    %c0_i32_1 = arith.constant 0 : i32
    return %c0_i32, %c0_i32_0 : i32, i32
  }
  func.func @transform_12(%arg0: i32) -> (i32, i32) {
    %c0_i32 = arith.constant 0 : i32
    %c0_i32_0 = arith.constant 0 : i32
    %c0_i32_1 = arith.constant 0 : i32
    return %c0_i32, %c0_i32_0 : i32, i32
  }
  func.func @transform_13(%arg0: i32) -> (i32, i32, i32) {
    %c0_i32 = arith.constant 0 : i32
    %c0_i32_0 = arith.constant 0 : i32
    %c0_i32_1 = arith.constant 0 : i32
    return %arg0, %c0_i32, %c0_i32_0 : i32, i32, i32
  }
}

module attributes {stable_mosaic.version = 11 : i64} {
  func.func @_decoder_step_kernel(%arg0: i32, %arg1: memref<1x8x32xf32, #tpu.memory_space<vmem>>, %arg2: memref<1x8x32xf32, #tpu.memory_space<vmem>>, %arg3: memref<32x96xf32, #tpu.memory_space<vmem>>, %arg4: memref<1x96xf32, #tpu.memory_space<vmem>>, %arg5: memref<32x32xf32, #tpu.memory_space<vmem>>, %arg6: memref<1x32xf32, #tpu.memory_space<vmem>>, %arg7: memref<1x32xf32, #tpu.memory_space<vmem>>, %arg8: memref<1x32xf32, #tpu.memory_space<vmem>>, %arg9: memref<32x32xf32, #tpu.memory_space<vmem>>, %arg10: memref<1x32xf32, #tpu.memory_space<vmem>>, %arg11: memref<32x64xf32, #tpu.memory_space<vmem>>, %arg12: memref<1x64xf32, #tpu.memory_space<vmem>>, %arg13: memref<32x32xf32, #tpu.memory_space<vmem>>, %arg14: memref<1x32xf32, #tpu.memory_space<vmem>>, %arg15: memref<1x32xf32, #tpu.memory_space<vmem>>, %arg16: memref<1x32xf32, #tpu.memory_space<vmem>>, %arg17: memref<32x64xf32, #tpu.memory_space<vmem>>, %arg18: memref<1x64xf32, #tpu.memory_space<vmem>>, %arg19: memref<64x32xf32, #tpu.memory_space<vmem>>, %arg20: memref<1x32xf32, #tpu.memory_space<vmem>>, %arg21: memref<1x32xf32, #tpu.memory_space<vmem>>, %arg22: memref<1x32xf32, #tpu.memory_space<vmem>>, %arg23: memref<32x128xf32, #tpu.memory_space<vmem>>, %arg24: memref<1x128xf32, #tpu.memory_space<vmem>>, %arg25: memref<1x8x128xf32, #tpu.memory_space<vmem>>) attributes {dimension_semantics = [#tpu.dimension_semantics<parallel>], iteration_bounds = array<i64: 2>, scalar_prefetch = 0 : i64, scratch_operands = 0 : i64, tpu.core_type = #tpu.core_type<tc>, window_params = [{transform_indices = @transform_0, window_bounds = array<i64: 1, 8, 32>}, {transform_indices = @transform_1, window_bounds = array<i64: 1, 8, 32>}, {pipeline_mode = #tpu.pipeline_mode<synchronous>, transform_indices = @transform_2, window_bounds = array<i64: 32, 96>}, {pipeline_mode = #tpu.pipeline_mode<synchronous>, transform_indices = @transform_3, window_bounds = array<i64: 1, 96>}, {pipeline_mode = #tpu.pipeline_mode<synchronous>, transform_indices = @transform_4, window_bounds = array<i64: 32, 32>}, {pipeline_mode = #tpu.pipeline_mode<synchronous>, transform_indices = @transform_5, window_bounds = array<i64: 1, 32>}, {pipeline_mode = #tpu.pipeline_mode<synchronous>, transform_indices = @transform_6, window_bounds = array<i64: 1, 32>}, {pipeline_mode = #tpu.pipeline_mode<synchronous>, transform_indices = @transform_7, window_bounds = array<i64: 1, 32>}, {pipeline_mode = #tpu.pipeline_mode<synchronous>, transform_indices = @transform_8, window_bounds = array<i64: 32, 32>}, {pipeline_mode = #tpu.pipeline_mode<synchronous>, transform_indices = @transform_9, window_bounds = array<i64: 1, 32>}, {pipeline_mode = #tpu.pipeline_mode<synchronous>, transform_indices = @transform_10, window_bounds = array<i64: 32, 64>}, {pipeline_mode = #tpu.pipeline_mode<synchronous>, transform_indices = @transform_11, window_bounds = array<i64: 1, 64>}, {pipeline_mode = #tpu.pipeline_mode<synchronous>, transform_indices = @transform_12, window_bounds = array<i64: 32, 32>}, {pipeline_mode = #tpu.pipeline_mode<synchronous>, transform_indices = @transform_13, window_bounds = array<i64: 1, 32>}, {pipeline_mode = #tpu.pipeline_mode<synchronous>, transform_indices = @transform_14, window_bounds = array<i64: 1, 32>}, {pipeline_mode = #tpu.pipeline_mode<synchronous>, transform_indices = @transform_15, window_bounds = array<i64: 1, 32>}, {pipeline_mode = #tpu.pipeline_mode<synchronous>, transform_indices = @transform_16, window_bounds = array<i64: 32, 64>}, {pipeline_mode = #tpu.pipeline_mode<synchronous>, transform_indices = @transform_17, window_bounds = array<i64: 1, 64>}, {pipeline_mode = #tpu.pipeline_mode<synchronous>, transform_indices = @transform_18, window_bounds = array<i64: 64, 32>}, {pipeline_mode = #tpu.pipeline_mode<synchronous>, transform_indices = @transform_19, window_bounds = array<i64: 1, 32>}, {pipeline_mode = #tpu.pipeline_mode<synchronous>, transform_indices = @transform_20, window_bounds = array<i64: 1, 32>}, {pipeline_mode = #tpu.pipeline_mode<synchronous>, transform_indices = @transform_21, window_bounds = array<i64: 1, 32>}, {pipeline_mode = #tpu.pipeline_mode<synchronous>, transform_indices = @transform_22, window_bounds = array<i64: 32, 128>}, {pipeline_mode = #tpu.pipeline_mode<synchronous>, transform_indices = @transform_23, window_bounds = array<i64: 1, 128>}, {transform_indices = @transform_24, window_bounds = array<i64: 1, 8, 128>}]} {
    %c0 = arith.constant 0 : index
    %c0_0 = arith.constant 0 : index
    %c0_1 = arith.constant 0 : index
    %0 = vector.load %arg1[%c0, %c0_0, %c0_1] : memref<1x8x32xf32, #tpu.memory_space<vmem>>, vector<1x8x32xf32>
    %1 = vector.shape_cast %0 : vector<1x8x32xf32> to vector<8x32xf32>
    %c0_2 = arith.constant 0 : index
    %c0_3 = arith.constant 0 : index
    %c0_4 = arith.constant 0 : index
    %2 = vector.load %arg2[%c0_2, %c0_3, %c0_4] : memref<1x8x32xf32, #tpu.memory_space<vmem>>, vector<1x8x32xf32>
    %3 = vector.shape_cast %2 : vector<1x8x32xf32> to vector<8x32xf32>
    %4 = tpu.iota {dimensions = array<i32: 0>} : vector<8x8xi32>
    %5 = tpu.iota {dimensions = array<i32: 1>} : vector<8x8xi32>
    %6 = arith.cmpi sge, %4, %5 : vector<8x8xi32>
    %cst = arith.constant 0.000000e+00 : f32
    %cst_5 = arith.constant -1.000000e+09 : f32
    %7 = vector.broadcast %cst : f32 to vector<8x8xf32>
    %8 = vector.broadcast %cst_5 : f32 to vector<8x8xf32>
    %9 = arith.select %6, %7, %8 : vector<8x8xi1>, vector<8x8xf32>
    %c0_6 = arith.constant 0 : index
    %c0_7 = arith.constant 0 : index
    %10 = vector.load %arg3[%c0_6, %c0_7] : memref<32x96xf32, #tpu.memory_space<vmem>>, vector<32x96xf32>
    %cst_8 = arith.constant dense<0.000000e+00> : vector<8x96xf32>
    %11 = tpu.matmul %1, %10, %cst_8 {dimension_numbers = #tpu.dot_dimension_numbers<[1], [0], [0], [1], [0, 0, 1, 1], [], []>} : vector<8x32xf32>, vector<32x96xf32>, vector<8x96xf32> -> vector<8x96xf32>
    %c0_9 = arith.constant 0 : index
    %c0_10 = arith.constant 0 : index
    %12 = vector.load %arg4[%c0_9, %c0_10] : memref<1x96xf32, #tpu.memory_space<vmem>>, vector<1x96xf32>
    %13 = vector.broadcast %12 : vector<1x96xf32> to vector<8x96xf32>
    %14 = arith.addf %11, %13 : vector<8x96xf32>
    %15 = vector.extract_strided_slice %14 {offsets = [0, 0], sizes = [8, 32], strides = [1, 1]} : vector<8x96xf32> to vector<8x32xf32>
    %16 = vector.extract_strided_slice %14 {offsets = [0, 32], sizes = [8, 32], strides = [1, 1]} : vector<8x96xf32> to vector<8x32xf32>
    %17 = vector.extract_strided_slice %14 {offsets = [0, 64], sizes = [8, 32], strides = [1, 1]} : vector<8x96xf32> to vector<8x32xf32>
    %c0_11 = arith.constant 0 : index
    %c0_12 = arith.constant 0 : index
    %18 = vector.load %arg5[%c0_11, %c0_12] : memref<32x32xf32, #tpu.memory_space<vmem>>, vector<32x32xf32>
    %c0_13 = arith.constant 0 : index
    %c0_14 = arith.constant 0 : index
    %19 = vector.load %arg6[%c0_13, %c0_14] : memref<1x32xf32, #tpu.memory_space<vmem>>, vector<1x32xf32>
    %cst_15 = arith.constant 0.000000e+00 : f32
    %20 = vector.broadcast %cst_15 : f32 to vector<8x32xf32>
    %21 = vector.extract_strided_slice %15 {offsets = [0, 0], sizes = [8, 8], strides = [1, 1]} : vector<8x32xf32> to vector<8x8xf32>
    %22 = vector.extract_strided_slice %16 {offsets = [0, 0], sizes = [8, 8], strides = [1, 1]} : vector<8x32xf32> to vector<8x8xf32>
    %23 = vector.extract_strided_slice %17 {offsets = [0, 0], sizes = [8, 8], strides = [1, 1]} : vector<8x32xf32> to vector<8x8xf32>
    %cst_16 = arith.constant dense<0.000000e+00> : vector<8x8xf32>
    %24 = tpu.matmul %21, %22, %cst_16 {dimension_numbers = #tpu.dot_dimension_numbers<[1], [1], [0], [0], [0, 0, 1, 0], [], []>} : vector<8x8xf32>, vector<8x8xf32>, vector<8x8xf32> -> vector<8x8xf32>
    %cst_17 = arith.constant 0.353553385 : f32
    %25 = vector.broadcast %cst_17 : f32 to vector<8x8xf32>
    %26 = arith.mulf %24, %25 : vector<8x8xf32>
    %27 = arith.addf %26, %9 : vector<8x8xf32>
    %cst_18 = arith.constant dense<0xFF800000> : vector<8xf32>
    %28 = vector.multi_reduction <maximumf>, %27, %cst_18 [1] : vector<8x8xf32> to vector<8xf32>
    %29 = vector.shape_cast %28 : vector<8xf32> to vector<8x1xf32>
    %30 = vector.broadcast %29 : vector<8x1xf32> to vector<8x8xf32>
    %31 = arith.subf %27, %30 : vector<8x8xf32>
    %32 = math.exp %31 : vector<8x8xf32>
    %cst_19 = arith.constant dense<0.000000e+00> : vector<8xf32>
    %33 = vector.multi_reduction <add>, %32, %cst_19 [1] : vector<8x8xf32> to vector<8xf32>
    %34 = vector.shape_cast %33 : vector<8xf32> to vector<8x1xf32>
    %35 = vector.broadcast %34 : vector<8x1xf32> to vector<8x8xf32>
    %36 = arith.divf %32, %35 : vector<8x8xf32>
    %cst_20 = arith.constant dense<0.000000e+00> : vector<8x8xf32>
    %37 = tpu.matmul %36, %23, %cst_20 {dimension_numbers = #tpu.dot_dimension_numbers<[1], [0], [0], [1], [0, 0, 1, 1], [], []>} : vector<8x8xf32>, vector<8x8xf32>, vector<8x8xf32> -> vector<8x8xf32>
    %38 = vector.extract_strided_slice %18 {offsets = [0, 0], sizes = [8, 32], strides = [1, 1]} : vector<32x32xf32> to vector<8x32xf32>
    %cst_21 = arith.constant dense<0.000000e+00> : vector<8x32xf32>
    %39 = tpu.matmul %37, %38, %cst_21 {dimension_numbers = #tpu.dot_dimension_numbers<[1], [0], [0], [1], [0, 0, 1, 1], [], []>} : vector<8x8xf32>, vector<8x32xf32>, vector<8x32xf32> -> vector<8x32xf32>
    %40 = arith.addf %20, %39 : vector<8x32xf32>
    %41 = vector.extract_strided_slice %15 {offsets = [0, 8], sizes = [8, 8], strides = [1, 1]} : vector<8x32xf32> to vector<8x8xf32>
    %42 = vector.extract_strided_slice %16 {offsets = [0, 8], sizes = [8, 8], strides = [1, 1]} : vector<8x32xf32> to vector<8x8xf32>
    %43 = vector.extract_strided_slice %17 {offsets = [0, 8], sizes = [8, 8], strides = [1, 1]} : vector<8x32xf32> to vector<8x8xf32>
    %cst_22 = arith.constant dense<0.000000e+00> : vector<8x8xf32>
    %44 = tpu.matmul %41, %42, %cst_22 {dimension_numbers = #tpu.dot_dimension_numbers<[1], [1], [0], [0], [0, 0, 1, 0], [], []>} : vector<8x8xf32>, vector<8x8xf32>, vector<8x8xf32> -> vector<8x8xf32>
    %cst_23 = arith.constant 0.353553385 : f32
    %45 = vector.broadcast %cst_23 : f32 to vector<8x8xf32>
    %46 = arith.mulf %44, %45 : vector<8x8xf32>
    %47 = arith.addf %46, %9 : vector<8x8xf32>
    %cst_24 = arith.constant dense<0xFF800000> : vector<8xf32>
    %48 = vector.multi_reduction <maximumf>, %47, %cst_24 [1] : vector<8x8xf32> to vector<8xf32>
    %49 = vector.shape_cast %48 : vector<8xf32> to vector<8x1xf32>
    %50 = vector.broadcast %49 : vector<8x1xf32> to vector<8x8xf32>
    %51 = arith.subf %47, %50 : vector<8x8xf32>
    %52 = math.exp %51 : vector<8x8xf32>
    %cst_25 = arith.constant dense<0.000000e+00> : vector<8xf32>
    %53 = vector.multi_reduction <add>, %52, %cst_25 [1] : vector<8x8xf32> to vector<8xf32>
    %54 = vector.shape_cast %53 : vector<8xf32> to vector<8x1xf32>
    %55 = vector.broadcast %54 : vector<8x1xf32> to vector<8x8xf32>
    %56 = arith.divf %52, %55 : vector<8x8xf32>
    %cst_26 = arith.constant dense<0.000000e+00> : vector<8x8xf32>
    %57 = tpu.matmul %56, %43, %cst_26 {dimension_numbers = #tpu.dot_dimension_numbers<[1], [0], [0], [1], [0, 0, 1, 1], [], []>} : vector<8x8xf32>, vector<8x8xf32>, vector<8x8xf32> -> vector<8x8xf32>
    %58 = vector.extract_strided_slice %18 {offsets = [8, 0], sizes = [8, 32], strides = [1, 1]} : vector<32x32xf32> to vector<8x32xf32>
    %cst_27 = arith.constant dense<0.000000e+00> : vector<8x32xf32>
    %59 = tpu.matmul %57, %58, %cst_27 {dimension_numbers = #tpu.dot_dimension_numbers<[1], [0], [0], [1], [0, 0, 1, 1], [], []>} : vector<8x8xf32>, vector<8x32xf32>, vector<8x32xf32> -> vector<8x32xf32>
    %60 = arith.addf %40, %59 : vector<8x32xf32>
    %61 = vector.extract_strided_slice %15 {offsets = [0, 16], sizes = [8, 8], strides = [1, 1]} : vector<8x32xf32> to vector<8x8xf32>
    %62 = vector.extract_strided_slice %16 {offsets = [0, 16], sizes = [8, 8], strides = [1, 1]} : vector<8x32xf32> to vector<8x8xf32>
    %63 = vector.extract_strided_slice %17 {offsets = [0, 16], sizes = [8, 8], strides = [1, 1]} : vector<8x32xf32> to vector<8x8xf32>
    %cst_28 = arith.constant dense<0.000000e+00> : vector<8x8xf32>
    %64 = tpu.matmul %61, %62, %cst_28 {dimension_numbers = #tpu.dot_dimension_numbers<[1], [1], [0], [0], [0, 0, 1, 0], [], []>} : vector<8x8xf32>, vector<8x8xf32>, vector<8x8xf32> -> vector<8x8xf32>
    %cst_29 = arith.constant 0.353553385 : f32
    %65 = vector.broadcast %cst_29 : f32 to vector<8x8xf32>
    %66 = arith.mulf %64, %65 : vector<8x8xf32>
    %67 = arith.addf %66, %9 : vector<8x8xf32>
    %cst_30 = arith.constant dense<0xFF800000> : vector<8xf32>
    %68 = vector.multi_reduction <maximumf>, %67, %cst_30 [1] : vector<8x8xf32> to vector<8xf32>
    %69 = vector.shape_cast %68 : vector<8xf32> to vector<8x1xf32>
    %70 = vector.broadcast %69 : vector<8x1xf32> to vector<8x8xf32>
    %71 = arith.subf %67, %70 : vector<8x8xf32>
    %72 = math.exp %71 : vector<8x8xf32>
    %cst_31 = arith.constant dense<0.000000e+00> : vector<8xf32>
    %73 = vector.multi_reduction <add>, %72, %cst_31 [1] : vector<8x8xf32> to vector<8xf32>
    %74 = vector.shape_cast %73 : vector<8xf32> to vector<8x1xf32>
    %75 = vector.broadcast %74 : vector<8x1xf32> to vector<8x8xf32>
    %76 = arith.divf %72, %75 : vector<8x8xf32>
    %cst_32 = arith.constant dense<0.000000e+00> : vector<8x8xf32>
    %77 = tpu.matmul %76, %63, %cst_32 {dimension_numbers = #tpu.dot_dimension_numbers<[1], [0], [0], [1], [0, 0, 1, 1], [], []>} : vector<8x8xf32>, vector<8x8xf32>, vector<8x8xf32> -> vector<8x8xf32>
    %78 = vector.extract_strided_slice %18 {offsets = [16, 0], sizes = [8, 32], strides = [1, 1]} : vector<32x32xf32> to vector<8x32xf32>
    %cst_33 = arith.constant dense<0.000000e+00> : vector<8x32xf32>
    %79 = tpu.matmul %77, %78, %cst_33 {dimension_numbers = #tpu.dot_dimension_numbers<[1], [0], [0], [1], [0, 0, 1, 1], [], []>} : vector<8x8xf32>, vector<8x32xf32>, vector<8x32xf32> -> vector<8x32xf32>
    %80 = arith.addf %60, %79 : vector<8x32xf32>
    %81 = vector.extract_strided_slice %15 {offsets = [0, 24], sizes = [8, 8], strides = [1, 1]} : vector<8x32xf32> to vector<8x8xf32>
    %82 = vector.extract_strided_slice %16 {offsets = [0, 24], sizes = [8, 8], strides = [1, 1]} : vector<8x32xf32> to vector<8x8xf32>
    %83 = vector.extract_strided_slice %17 {offsets = [0, 24], sizes = [8, 8], strides = [1, 1]} : vector<8x32xf32> to vector<8x8xf32>
    %cst_34 = arith.constant dense<0.000000e+00> : vector<8x8xf32>
    %84 = tpu.matmul %81, %82, %cst_34 {dimension_numbers = #tpu.dot_dimension_numbers<[1], [1], [0], [0], [0, 0, 1, 0], [], []>} : vector<8x8xf32>, vector<8x8xf32>, vector<8x8xf32> -> vector<8x8xf32>
    %cst_35 = arith.constant 0.353553385 : f32
    %85 = vector.broadcast %cst_35 : f32 to vector<8x8xf32>
    %86 = arith.mulf %84, %85 : vector<8x8xf32>
    %87 = arith.addf %86, %9 : vector<8x8xf32>
    %cst_36 = arith.constant dense<0xFF800000> : vector<8xf32>
    %88 = vector.multi_reduction <maximumf>, %87, %cst_36 [1] : vector<8x8xf32> to vector<8xf32>
    %89 = vector.shape_cast %88 : vector<8xf32> to vector<8x1xf32>
    %90 = vector.broadcast %89 : vector<8x1xf32> to vector<8x8xf32>
    %91 = arith.subf %87, %90 : vector<8x8xf32>
    %92 = math.exp %91 : vector<8x8xf32>
    %cst_37 = arith.constant dense<0.000000e+00> : vector<8xf32>
    %93 = vector.multi_reduction <add>, %92, %cst_37 [1] : vector<8x8xf32> to vector<8xf32>
    %94 = vector.shape_cast %93 : vector<8xf32> to vector<8x1xf32>
    %95 = vector.broadcast %94 : vector<8x1xf32> to vector<8x8xf32>
    %96 = arith.divf %92, %95 : vector<8x8xf32>
    %cst_38 = arith.constant dense<0.000000e+00> : vector<8x8xf32>
    %97 = tpu.matmul %96, %83, %cst_38 {dimension_numbers = #tpu.dot_dimension_numbers<[1], [0], [0], [1], [0, 0, 1, 1], [], []>} : vector<8x8xf32>, vector<8x8xf32>, vector<8x8xf32> -> vector<8x8xf32>
    %98 = vector.extract_strided_slice %18 {offsets = [24, 0], sizes = [8, 32], strides = [1, 1]} : vector<32x32xf32> to vector<8x32xf32>
    %cst_39 = arith.constant dense<0.000000e+00> : vector<8x32xf32>
    %99 = tpu.matmul %97, %98, %cst_39 {dimension_numbers = #tpu.dot_dimension_numbers<[1], [0], [0], [1], [0, 0, 1, 1], [], []>} : vector<8x8xf32>, vector<8x32xf32>, vector<8x32xf32> -> vector<8x32xf32>
    %100 = arith.addf %80, %99 : vector<8x32xf32>
    %101 = vector.broadcast %19 : vector<1x32xf32> to vector<8x32xf32>
    %102 = arith.addf %100, %101 : vector<8x32xf32>
    %103 = arith.addf %1, %102 : vector<8x32xf32>
    %c0_40 = arith.constant 0 : index
    %c0_41 = arith.constant 0 : index
    %104 = vector.load %arg7[%c0_40, %c0_41] : memref<1x32xf32, #tpu.memory_space<vmem>>, vector<1x32xf32>
    %c0_42 = arith.constant 0 : index
    %c0_43 = arith.constant 0 : index
    %105 = vector.load %arg8[%c0_42, %c0_43] : memref<1x32xf32, #tpu.memory_space<vmem>>, vector<1x32xf32>
    %cst_44 = arith.constant dense<0.000000e+00> : vector<8xf32>
    %106 = vector.multi_reduction <add>, %103, %cst_44 [1] : vector<8x32xf32> to vector<8xf32>
    %107 = vector.shape_cast %106 : vector<8xf32> to vector<8x1xf32>
    %cst_45 = arith.constant 3.200000e+01 : f32
    %108 = vector.broadcast %cst_45 : f32 to vector<8x1xf32>
    %109 = arith.divf %107, %108 : vector<8x1xf32>
    %110 = vector.broadcast %109 : vector<8x1xf32> to vector<8x32xf32>
    %111 = arith.subf %103, %110 : vector<8x32xf32>
    %112 = arith.mulf %111, %111 : vector<8x32xf32>
    %cst_46 = arith.constant dense<0.000000e+00> : vector<8xf32>
    %113 = vector.multi_reduction <add>, %112, %cst_46 [1] : vector<8x32xf32> to vector<8xf32>
    %114 = vector.shape_cast %113 : vector<8xf32> to vector<8x1xf32>
    %cst_47 = arith.constant 3.200000e+01 : f32
    %115 = vector.broadcast %cst_47 : f32 to vector<8x1xf32>
    %116 = arith.divf %114, %115 : vector<8x1xf32>
    %117 = vector.broadcast %109 : vector<8x1xf32> to vector<8x32xf32>
    %118 = arith.subf %103, %117 : vector<8x32xf32>
    %cst_48 = arith.constant 9.99999974E-6 : f32
    %119 = vector.broadcast %cst_48 : f32 to vector<8x1xf32>
    %120 = arith.addf %116, %119 : vector<8x1xf32>
    %121 = math.rsqrt %120 : vector<8x1xf32>
    %122 = vector.broadcast %121 : vector<8x1xf32> to vector<8x32xf32>
    %123 = arith.mulf %118, %122 : vector<8x32xf32>
    %124 = vector.broadcast %104 : vector<1x32xf32> to vector<8x32xf32>
    %125 = arith.mulf %123, %124 : vector<8x32xf32>
    %126 = vector.broadcast %105 : vector<1x32xf32> to vector<8x32xf32>
    %127 = arith.addf %125, %126 : vector<8x32xf32>
    %c0_49 = arith.constant 0 : index
    %c0_50 = arith.constant 0 : index
    %128 = vector.load %arg9[%c0_49, %c0_50] : memref<32x32xf32, #tpu.memory_space<vmem>>, vector<32x32xf32>
    %cst_51 = arith.constant dense<0.000000e+00> : vector<8x32xf32>
    %129 = tpu.matmul %127, %128, %cst_51 {dimension_numbers = #tpu.dot_dimension_numbers<[1], [0], [0], [1], [0, 0, 1, 1], [], []>} : vector<8x32xf32>, vector<32x32xf32>, vector<8x32xf32> -> vector<8x32xf32>
    %c0_52 = arith.constant 0 : index
    %c0_53 = arith.constant 0 : index
    %130 = vector.load %arg10[%c0_52, %c0_53] : memref<1x32xf32, #tpu.memory_space<vmem>>, vector<1x32xf32>
    %131 = vector.broadcast %130 : vector<1x32xf32> to vector<8x32xf32>
    %132 = arith.addf %129, %131 : vector<8x32xf32>
    %c0_54 = arith.constant 0 : index
    %c0_55 = arith.constant 0 : index
    %133 = vector.load %arg11[%c0_54, %c0_55] : memref<32x64xf32, #tpu.memory_space<vmem>>, vector<32x64xf32>
    %cst_56 = arith.constant dense<0.000000e+00> : vector<8x64xf32>
    %134 = tpu.matmul %3, %133, %cst_56 {dimension_numbers = #tpu.dot_dimension_numbers<[1], [0], [0], [1], [0, 0, 1, 1], [], []>} : vector<8x32xf32>, vector<32x64xf32>, vector<8x64xf32> -> vector<8x64xf32>
    %c0_57 = arith.constant 0 : index
    %c0_58 = arith.constant 0 : index
    %135 = vector.load %arg12[%c0_57, %c0_58] : memref<1x64xf32, #tpu.memory_space<vmem>>, vector<1x64xf32>
    %136 = vector.broadcast %135 : vector<1x64xf32> to vector<8x64xf32>
    %137 = arith.addf %134, %136 : vector<8x64xf32>
    %138 = vector.extract_strided_slice %137 {offsets = [0, 0], sizes = [8, 32], strides = [1, 1]} : vector<8x64xf32> to vector<8x32xf32>
    %139 = vector.extract_strided_slice %137 {offsets = [0, 32], sizes = [8, 32], strides = [1, 1]} : vector<8x64xf32> to vector<8x32xf32>
    %c0_59 = arith.constant 0 : index
    %c0_60 = arith.constant 0 : index
    %140 = vector.load %arg13[%c0_59, %c0_60] : memref<32x32xf32, #tpu.memory_space<vmem>>, vector<32x32xf32>
    %c0_61 = arith.constant 0 : index
    %c0_62 = arith.constant 0 : index
    %141 = vector.load %arg14[%c0_61, %c0_62] : memref<1x32xf32, #tpu.memory_space<vmem>>, vector<1x32xf32>
    %cst_63 = arith.constant 0.000000e+00 : f32
    %142 = vector.broadcast %cst_63 : f32 to vector<8x32xf32>
    %143 = vector.extract_strided_slice %132 {offsets = [0, 0], sizes = [8, 8], strides = [1, 1]} : vector<8x32xf32> to vector<8x8xf32>
    %144 = vector.extract_strided_slice %138 {offsets = [0, 0], sizes = [8, 8], strides = [1, 1]} : vector<8x32xf32> to vector<8x8xf32>
    %145 = vector.extract_strided_slice %139 {offsets = [0, 0], sizes = [8, 8], strides = [1, 1]} : vector<8x32xf32> to vector<8x8xf32>
    %cst_64 = arith.constant dense<0.000000e+00> : vector<8x8xf32>
    %146 = tpu.matmul %143, %144, %cst_64 {dimension_numbers = #tpu.dot_dimension_numbers<[1], [1], [0], [0], [0, 0, 1, 0], [], []>} : vector<8x8xf32>, vector<8x8xf32>, vector<8x8xf32> -> vector<8x8xf32>
    %cst_65 = arith.constant 0.353553385 : f32
    %147 = vector.broadcast %cst_65 : f32 to vector<8x8xf32>
    %148 = arith.mulf %146, %147 : vector<8x8xf32>
    %cst_66 = arith.constant dense<0xFF800000> : vector<8xf32>
    %149 = vector.multi_reduction <maximumf>, %148, %cst_66 [1] : vector<8x8xf32> to vector<8xf32>
    %150 = vector.shape_cast %149 : vector<8xf32> to vector<8x1xf32>
    %151 = vector.broadcast %150 : vector<8x1xf32> to vector<8x8xf32>
    %152 = arith.subf %148, %151 : vector<8x8xf32>
    %153 = math.exp %152 : vector<8x8xf32>
    %cst_67 = arith.constant dense<0.000000e+00> : vector<8xf32>
    %154 = vector.multi_reduction <add>, %153, %cst_67 [1] : vector<8x8xf32> to vector<8xf32>
    %155 = vector.shape_cast %154 : vector<8xf32> to vector<8x1xf32>
    %156 = vector.broadcast %155 : vector<8x1xf32> to vector<8x8xf32>
    %157 = arith.divf %153, %156 : vector<8x8xf32>
    %cst_68 = arith.constant dense<0.000000e+00> : vector<8x8xf32>
    %158 = tpu.matmul %157, %145, %cst_68 {dimension_numbers = #tpu.dot_dimension_numbers<[1], [0], [0], [1], [0, 0, 1, 1], [], []>} : vector<8x8xf32>, vector<8x8xf32>, vector<8x8xf32> -> vector<8x8xf32>
    %159 = vector.extract_strided_slice %140 {offsets = [0, 0], sizes = [8, 32], strides = [1, 1]} : vector<32x32xf32> to vector<8x32xf32>
    %cst_69 = arith.constant dense<0.000000e+00> : vector<8x32xf32>
    %160 = tpu.matmul %158, %159, %cst_69 {dimension_numbers = #tpu.dot_dimension_numbers<[1], [0], [0], [1], [0, 0, 1, 1], [], []>} : vector<8x8xf32>, vector<8x32xf32>, vector<8x32xf32> -> vector<8x32xf32>
    %161 = arith.addf %142, %160 : vector<8x32xf32>
    %162 = vector.extract_strided_slice %132 {offsets = [0, 8], sizes = [8, 8], strides = [1, 1]} : vector<8x32xf32> to vector<8x8xf32>
    %163 = vector.extract_strided_slice %138 {offsets = [0, 8], sizes = [8, 8], strides = [1, 1]} : vector<8x32xf32> to vector<8x8xf32>
    %164 = vector.extract_strided_slice %139 {offsets = [0, 8], sizes = [8, 8], strides = [1, 1]} : vector<8x32xf32> to vector<8x8xf32>
    %cst_70 = arith.constant dense<0.000000e+00> : vector<8x8xf32>
    %165 = tpu.matmul %162, %163, %cst_70 {dimension_numbers = #tpu.dot_dimension_numbers<[1], [1], [0], [0], [0, 0, 1, 0], [], []>} : vector<8x8xf32>, vector<8x8xf32>, vector<8x8xf32> -> vector<8x8xf32>
    %cst_71 = arith.constant 0.353553385 : f32
    %166 = vector.broadcast %cst_71 : f32 to vector<8x8xf32>
    %167 = arith.mulf %165, %166 : vector<8x8xf32>
    %cst_72 = arith.constant dense<0xFF800000> : vector<8xf32>
    %168 = vector.multi_reduction <maximumf>, %167, %cst_72 [1] : vector<8x8xf32> to vector<8xf32>
    %169 = vector.shape_cast %168 : vector<8xf32> to vector<8x1xf32>
    %170 = vector.broadcast %169 : vector<8x1xf32> to vector<8x8xf32>
    %171 = arith.subf %167, %170 : vector<8x8xf32>
    %172 = math.exp %171 : vector<8x8xf32>
    %cst_73 = arith.constant dense<0.000000e+00> : vector<8xf32>
    %173 = vector.multi_reduction <add>, %172, %cst_73 [1] : vector<8x8xf32> to vector<8xf32>
    %174 = vector.shape_cast %173 : vector<8xf32> to vector<8x1xf32>
    %175 = vector.broadcast %174 : vector<8x1xf32> to vector<8x8xf32>
    %176 = arith.divf %172, %175 : vector<8x8xf32>
    %cst_74 = arith.constant dense<0.000000e+00> : vector<8x8xf32>
    %177 = tpu.matmul %176, %164, %cst_74 {dimension_numbers = #tpu.dot_dimension_numbers<[1], [0], [0], [1], [0, 0, 1, 1], [], []>} : vector<8x8xf32>, vector<8x8xf32>, vector<8x8xf32> -> vector<8x8xf32>
    %178 = vector.extract_strided_slice %140 {offsets = [8, 0], sizes = [8, 32], strides = [1, 1]} : vector<32x32xf32> to vector<8x32xf32>
    %cst_75 = arith.constant dense<0.000000e+00> : vector<8x32xf32>
    %179 = tpu.matmul %177, %178, %cst_75 {dimension_numbers = #tpu.dot_dimension_numbers<[1], [0], [0], [1], [0, 0, 1, 1], [], []>} : vector<8x8xf32>, vector<8x32xf32>, vector<8x32xf32> -> vector<8x32xf32>
    %180 = arith.addf %161, %179 : vector<8x32xf32>
    %181 = vector.extract_strided_slice %132 {offsets = [0, 16], sizes = [8, 8], strides = [1, 1]} : vector<8x32xf32> to vector<8x8xf32>
    %182 = vector.extract_strided_slice %138 {offsets = [0, 16], sizes = [8, 8], strides = [1, 1]} : vector<8x32xf32> to vector<8x8xf32>
    %183 = vector.extract_strided_slice %139 {offsets = [0, 16], sizes = [8, 8], strides = [1, 1]} : vector<8x32xf32> to vector<8x8xf32>
    %cst_76 = arith.constant dense<0.000000e+00> : vector<8x8xf32>
    %184 = tpu.matmul %181, %182, %cst_76 {dimension_numbers = #tpu.dot_dimension_numbers<[1], [1], [0], [0], [0, 0, 1, 0], [], []>} : vector<8x8xf32>, vector<8x8xf32>, vector<8x8xf32> -> vector<8x8xf32>
    %cst_77 = arith.constant 0.353553385 : f32
    %185 = vector.broadcast %cst_77 : f32 to vector<8x8xf32>
    %186 = arith.mulf %184, %185 : vector<8x8xf32>
    %cst_78 = arith.constant dense<0xFF800000> : vector<8xf32>
    %187 = vector.multi_reduction <maximumf>, %186, %cst_78 [1] : vector<8x8xf32> to vector<8xf32>
    %188 = vector.shape_cast %187 : vector<8xf32> to vector<8x1xf32>
    %189 = vector.broadcast %188 : vector<8x1xf32> to vector<8x8xf32>
    %190 = arith.subf %186, %189 : vector<8x8xf32>
    %191 = math.exp %190 : vector<8x8xf32>
    %cst_79 = arith.constant dense<0.000000e+00> : vector<8xf32>
    %192 = vector.multi_reduction <add>, %191, %cst_79 [1] : vector<8x8xf32> to vector<8xf32>
    %193 = vector.shape_cast %192 : vector<8xf32> to vector<8x1xf32>
    %194 = vector.broadcast %193 : vector<8x1xf32> to vector<8x8xf32>
    %195 = arith.divf %191, %194 : vector<8x8xf32>
    %cst_80 = arith.constant dense<0.000000e+00> : vector<8x8xf32>
    %196 = tpu.matmul %195, %183, %cst_80 {dimension_numbers = #tpu.dot_dimension_numbers<[1], [0], [0], [1], [0, 0, 1, 1], [], []>} : vector<8x8xf32>, vector<8x8xf32>, vector<8x8xf32> -> vector<8x8xf32>
    %197 = vector.extract_strided_slice %140 {offsets = [16, 0], sizes = [8, 32], strides = [1, 1]} : vector<32x32xf32> to vector<8x32xf32>
    %cst_81 = arith.constant dense<0.000000e+00> : vector<8x32xf32>
    %198 = tpu.matmul %196, %197, %cst_81 {dimension_numbers = #tpu.dot_dimension_numbers<[1], [0], [0], [1], [0, 0, 1, 1], [], []>} : vector<8x8xf32>, vector<8x32xf32>, vector<8x32xf32> -> vector<8x32xf32>
    %199 = arith.addf %180, %198 : vector<8x32xf32>
    %200 = vector.extract_strided_slice %132 {offsets = [0, 24], sizes = [8, 8], strides = [1, 1]} : vector<8x32xf32> to vector<8x8xf32>
    %201 = vector.extract_strided_slice %138 {offsets = [0, 24], sizes = [8, 8], strides = [1, 1]} : vector<8x32xf32> to vector<8x8xf32>
    %202 = vector.extract_strided_slice %139 {offsets = [0, 24], sizes = [8, 8], strides = [1, 1]} : vector<8x32xf32> to vector<8x8xf32>
    %cst_82 = arith.constant dense<0.000000e+00> : vector<8x8xf32>
    %203 = tpu.matmul %200, %201, %cst_82 {dimension_numbers = #tpu.dot_dimension_numbers<[1], [1], [0], [0], [0, 0, 1, 0], [], []>} : vector<8x8xf32>, vector<8x8xf32>, vector<8x8xf32> -> vector<8x8xf32>
    %cst_83 = arith.constant 0.353553385 : f32
    %204 = vector.broadcast %cst_83 : f32 to vector<8x8xf32>
    %205 = arith.mulf %203, %204 : vector<8x8xf32>
    %cst_84 = arith.constant dense<0xFF800000> : vector<8xf32>
    %206 = vector.multi_reduction <maximumf>, %205, %cst_84 [1] : vector<8x8xf32> to vector<8xf32>
    %207 = vector.shape_cast %206 : vector<8xf32> to vector<8x1xf32>
    %208 = vector.broadcast %207 : vector<8x1xf32> to vector<8x8xf32>
    %209 = arith.subf %205, %208 : vector<8x8xf32>
    %210 = math.exp %209 : vector<8x8xf32>
    %cst_85 = arith.constant dense<0.000000e+00> : vector<8xf32>
    %211 = vector.multi_reduction <add>, %210, %cst_85 [1] : vector<8x8xf32> to vector<8xf32>
    %212 = vector.shape_cast %211 : vector<8xf32> to vector<8x1xf32>
    %213 = vector.broadcast %212 : vector<8x1xf32> to vector<8x8xf32>
    %214 = arith.divf %210, %213 : vector<8x8xf32>
    %cst_86 = arith.constant dense<0.000000e+00> : vector<8x8xf32>
    %215 = tpu.matmul %214, %202, %cst_86 {dimension_numbers = #tpu.dot_dimension_numbers<[1], [0], [0], [1], [0, 0, 1, 1], [], []>} : vector<8x8xf32>, vector<8x8xf32>, vector<8x8xf32> -> vector<8x8xf32>
    %216 = vector.extract_strided_slice %140 {offsets = [24, 0], sizes = [8, 32], strides = [1, 1]} : vector<32x32xf32> to vector<8x32xf32>
    %cst_87 = arith.constant dense<0.000000e+00> : vector<8x32xf32>
    %217 = tpu.matmul %215, %216, %cst_87 {dimension_numbers = #tpu.dot_dimension_numbers<[1], [0], [0], [1], [0, 0, 1, 1], [], []>} : vector<8x8xf32>, vector<8x32xf32>, vector<8x32xf32> -> vector<8x32xf32>
    %218 = arith.addf %199, %217 : vector<8x32xf32>
    %219 = vector.broadcast %141 : vector<1x32xf32> to vector<8x32xf32>
    %220 = arith.addf %218, %219 : vector<8x32xf32>
    %221 = arith.addf %127, %220 : vector<8x32xf32>
    %c0_88 = arith.constant 0 : index
    %c0_89 = arith.constant 0 : index
    %222 = vector.load %arg15[%c0_88, %c0_89] : memref<1x32xf32, #tpu.memory_space<vmem>>, vector<1x32xf32>
    %c0_90 = arith.constant 0 : index
    %c0_91 = arith.constant 0 : index
    %223 = vector.load %arg16[%c0_90, %c0_91] : memref<1x32xf32, #tpu.memory_space<vmem>>, vector<1x32xf32>
    %cst_92 = arith.constant dense<0.000000e+00> : vector<8xf32>
    %224 = vector.multi_reduction <add>, %221, %cst_92 [1] : vector<8x32xf32> to vector<8xf32>
    %225 = vector.shape_cast %224 : vector<8xf32> to vector<8x1xf32>
    %cst_93 = arith.constant 3.200000e+01 : f32
    %226 = vector.broadcast %cst_93 : f32 to vector<8x1xf32>
    %227 = arith.divf %225, %226 : vector<8x1xf32>
    %228 = vector.broadcast %227 : vector<8x1xf32> to vector<8x32xf32>
    %229 = arith.subf %221, %228 : vector<8x32xf32>
    %230 = arith.mulf %229, %229 : vector<8x32xf32>
    %cst_94 = arith.constant dense<0.000000e+00> : vector<8xf32>
    %231 = vector.multi_reduction <add>, %230, %cst_94 [1] : vector<8x32xf32> to vector<8xf32>
    %232 = vector.shape_cast %231 : vector<8xf32> to vector<8x1xf32>
    %cst_95 = arith.constant 3.200000e+01 : f32
    %233 = vector.broadcast %cst_95 : f32 to vector<8x1xf32>
    %234 = arith.divf %232, %233 : vector<8x1xf32>
    %235 = vector.broadcast %227 : vector<8x1xf32> to vector<8x32xf32>
    %236 = arith.subf %221, %235 : vector<8x32xf32>
    %cst_96 = arith.constant 9.99999974E-6 : f32
    %237 = vector.broadcast %cst_96 : f32 to vector<8x1xf32>
    %238 = arith.addf %234, %237 : vector<8x1xf32>
    %239 = math.rsqrt %238 : vector<8x1xf32>
    %240 = vector.broadcast %239 : vector<8x1xf32> to vector<8x32xf32>
    %241 = arith.mulf %236, %240 : vector<8x32xf32>
    %242 = vector.broadcast %222 : vector<1x32xf32> to vector<8x32xf32>
    %243 = arith.mulf %241, %242 : vector<8x32xf32>
    %244 = vector.broadcast %223 : vector<1x32xf32> to vector<8x32xf32>
    %245 = arith.addf %243, %244 : vector<8x32xf32>
    %c0_97 = arith.constant 0 : index
    %c0_98 = arith.constant 0 : index
    %246 = vector.load %arg17[%c0_97, %c0_98] : memref<32x64xf32, #tpu.memory_space<vmem>>, vector<32x64xf32>
    %cst_99 = arith.constant dense<0.000000e+00> : vector<8x64xf32>
    %247 = tpu.matmul %245, %246, %cst_99 {dimension_numbers = #tpu.dot_dimension_numbers<[1], [0], [0], [1], [0, 0, 1, 1], [], []>} : vector<8x32xf32>, vector<32x64xf32>, vector<8x64xf32> -> vector<8x64xf32>
    %c0_100 = arith.constant 0 : index
    %c0_101 = arith.constant 0 : index
    %248 = vector.load %arg18[%c0_100, %c0_101] : memref<1x64xf32, #tpu.memory_space<vmem>>, vector<1x64xf32>
    %249 = vector.broadcast %248 : vector<1x64xf32> to vector<8x64xf32>
    %250 = arith.addf %247, %249 : vector<8x64xf32>
    %cst_102 = arith.constant 0.000000e+00 : f32
    %251 = vector.broadcast %cst_102 : f32 to vector<8x64xf32>
    %252 = arith.maximumf %250, %251 : vector<8x64xf32>
    %c0_103 = arith.constant 0 : index
    %c0_104 = arith.constant 0 : index
    %253 = vector.load %arg19[%c0_103, %c0_104] : memref<64x32xf32, #tpu.memory_space<vmem>>, vector<64x32xf32>
    %cst_105 = arith.constant dense<0.000000e+00> : vector<8x32xf32>
    %254 = tpu.matmul %252, %253, %cst_105 {dimension_numbers = #tpu.dot_dimension_numbers<[1], [0], [0], [1], [0, 0, 1, 1], [], []>} : vector<8x64xf32>, vector<64x32xf32>, vector<8x32xf32> -> vector<8x32xf32>
    %c0_106 = arith.constant 0 : index
    %c0_107 = arith.constant 0 : index
    %255 = vector.load %arg20[%c0_106, %c0_107] : memref<1x32xf32, #tpu.memory_space<vmem>>, vector<1x32xf32>
    %256 = vector.broadcast %255 : vector<1x32xf32> to vector<8x32xf32>
    %257 = arith.addf %254, %256 : vector<8x32xf32>
    %258 = arith.addf %245, %257 : vector<8x32xf32>
    %c0_108 = arith.constant 0 : index
    %c0_109 = arith.constant 0 : index
    %259 = vector.load %arg21[%c0_108, %c0_109] : memref<1x32xf32, #tpu.memory_space<vmem>>, vector<1x32xf32>
    %c0_110 = arith.constant 0 : index
    %c0_111 = arith.constant 0 : index
    %260 = vector.load %arg22[%c0_110, %c0_111] : memref<1x32xf32, #tpu.memory_space<vmem>>, vector<1x32xf32>
    %cst_112 = arith.constant dense<0.000000e+00> : vector<8xf32>
    %261 = vector.multi_reduction <add>, %258, %cst_112 [1] : vector<8x32xf32> to vector<8xf32>
    %262 = vector.shape_cast %261 : vector<8xf32> to vector<8x1xf32>
    %cst_113 = arith.constant 3.200000e+01 : f32
    %263 = vector.broadcast %cst_113 : f32 to vector<8x1xf32>
    %264 = arith.divf %262, %263 : vector<8x1xf32>
    %265 = vector.broadcast %264 : vector<8x1xf32> to vector<8x32xf32>
    %266 = arith.subf %258, %265 : vector<8x32xf32>
    %267 = arith.mulf %266, %266 : vector<8x32xf32>
    %cst_114 = arith.constant dense<0.000000e+00> : vector<8xf32>
    %268 = vector.multi_reduction <add>, %267, %cst_114 [1] : vector<8x32xf32> to vector<8xf32>
    %269 = vector.shape_cast %268 : vector<8xf32> to vector<8x1xf32>
    %cst_115 = arith.constant 3.200000e+01 : f32
    %270 = vector.broadcast %cst_115 : f32 to vector<8x1xf32>
    %271 = arith.divf %269, %270 : vector<8x1xf32>
    %272 = vector.broadcast %264 : vector<8x1xf32> to vector<8x32xf32>
    %273 = arith.subf %258, %272 : vector<8x32xf32>
    %cst_116 = arith.constant 9.99999974E-6 : f32
    %274 = vector.broadcast %cst_116 : f32 to vector<8x1xf32>
    %275 = arith.addf %271, %274 : vector<8x1xf32>
    %276 = math.rsqrt %275 : vector<8x1xf32>
    %277 = vector.broadcast %276 : vector<8x1xf32> to vector<8x32xf32>
    %278 = arith.mulf %273, %277 : vector<8x32xf32>
    %279 = vector.broadcast %259 : vector<1x32xf32> to vector<8x32xf32>
    %280 = arith.mulf %278, %279 : vector<8x32xf32>
    %281 = vector.broadcast %260 : vector<1x32xf32> to vector<8x32xf32>
    %282 = arith.addf %280, %281 : vector<8x32xf32>
    %c0_117 = arith.constant 0 : index
    %c0_118 = arith.constant 0 : index
    %283 = vector.load %arg23[%c0_117, %c0_118] : memref<32x128xf32, #tpu.memory_space<vmem>>, vector<32x128xf32>
    %cst_119 = arith.constant dense<0.000000e+00> : vector<8x128xf32>
    %284 = tpu.matmul %282, %283, %cst_119 {dimension_numbers = #tpu.dot_dimension_numbers<[1], [0], [0], [1], [0, 0, 1, 1], [], []>} : vector<8x32xf32>, vector<32x128xf32>, vector<8x128xf32> -> vector<8x128xf32>
    %c0_120 = arith.constant 0 : index
    %c0_121 = arith.constant 0 : index
    %285 = vector.load %arg24[%c0_120, %c0_121] : memref<1x128xf32, #tpu.memory_space<vmem>>, vector<1x128xf32>
    %286 = vector.broadcast %285 : vector<1x128xf32> to vector<8x128xf32>
    %287 = arith.addf %284, %286 : vector<8x128xf32>
    %c0_122 = arith.constant 0 : index
    %c0_123 = arith.constant 0 : index
    %c0_124 = arith.constant 0 : index
    %288 = vector.load %arg25[%c0_122, %c0_123, %c0_124] : memref<1x8x128xf32, #tpu.memory_space<vmem>>, vector<1x8x128xf32>
    %289 = vector.shape_cast %288 : vector<1x8x128xf32> to vector<8x128xf32>
    %290 = vector.shape_cast %287 : vector<8x128xf32> to vector<1x8x128xf32>
    tpu.vector_store %arg25[%c0_122, %c0_123, %c0_124], %290 {strides = array<i32>} : memref<1x8x128xf32, #tpu.memory_space<vmem>>, vector<1x8x128xf32>,
    return
  }
  func.func @transform_0(%arg0: i32) -> (i32, i32, i32) {
    %c0_i32 = arith.constant 0 : i32
    %c0_i32_0 = arith.constant 0 : i32
    %c0_i32_1 = arith.constant 0 : i32
    return %arg0, %c0_i32, %c0_i32_0 : i32, i32, i32
  }
  func.func @transform_1(%arg0: i32) -> (i32, i32, i32) {
    %c0_i32 = arith.constant 0 : i32
    %c0_i32_0 = arith.constant 0 : i32
    %c0_i32_1 = arith.constant 0 : i32
    return %arg0, %c0_i32, %c0_i32_0 : i32, i32, i32
  }
  func.func @transform_2(%arg0: i32) -> (i32, i32) {
    %c0_i32 = arith.constant 0 : i32
    %c0_i32_0 = arith.constant 0 : i32
    %c0_i32_1 = arith.constant 0 : i32
    return %c0_i32, %c0_i32_0 : i32, i32
  }
  func.func @transform_3(%arg0: i32) -> (i32, i32) {
    %c0_i32 = arith.constant 0 : i32
    %c0_i32_0 = arith.constant 0 : i32
    %c0_i32_1 = arith.constant 0 : i32
    return %c0_i32, %c0_i32_0 : i32, i32
  }
  func.func @transform_4(%arg0: i32) -> (i32, i32) {
    %c0_i32 = arith.constant 0 : i32
    %c0_i32_0 = arith.constant 0 : i32
    %c0_i32_1 = arith.constant 0 : i32
    return %c0_i32, %c0_i32_0 : i32, i32
  }
  func.func @transform_5(%arg0: i32) -> (i32, i32) {
    %c0_i32 = arith.constant 0 : i32
    %c0_i32_0 = arith.constant 0 : i32
    %c0_i32_1 = arith.constant 0 : i32
    return %c0_i32, %c0_i32_0 : i32, i32
  }
  func.func @transform_6(%arg0: i32) -> (i32, i32) {
    %c0_i32 = arith.constant 0 : i32
    %c0_i32_0 = arith.constant 0 : i32
    %c0_i32_1 = arith.constant 0 : i32
    return %c0_i32, %c0_i32_0 : i32, i32
  }
  func.func @transform_7(%arg0: i32) -> (i32, i32) {
    %c0_i32 = arith.constant 0 : i32
    %c0_i32_0 = arith.constant 0 : i32
    %c0_i32_1 = arith.constant 0 : i32
    return %c0_i32, %c0_i32_0 : i32, i32
  }
  func.func @transform_8(%arg0: i32) -> (i32, i32) {
    %c0_i32 = arith.constant 0 : i32
    %c0_i32_0 = arith.constant 0 : i32
    %c0_i32_1 = arith.constant 0 : i32
    return %c0_i32, %c0_i32_0 : i32, i32
  }
  func.func @transform_9(%arg0: i32) -> (i32, i32) {
    %c0_i32 = arith.constant 0 : i32
    %c0_i32_0 = arith.constant 0 : i32
    %c0_i32_1 = arith.constant 0 : i32
    return %c0_i32, %c0_i32_0 : i32, i32
  }
  func.func @transform_10(%arg0: i32) -> (i32, i32) {
    %c0_i32 = arith.constant 0 : i32
    %c0_i32_0 = arith.constant 0 : i32
    %c0_i32_1 = arith.constant 0 : i32
    return %c0_i32, %c0_i32_0 : i32, i32
  }
  func.func @transform_11(%arg0: i32) -> (i32, i32) {
    %c0_i32 = arith.constant 0 : i32
    %c0_i32_0 = arith.constant 0 : i32
    %c0_i32_1 = arith.constant 0 : i32
    return %c0_i32, %c0_i32_0 : i32, i32
  }
  func.func @transform_12(%arg0: i32) -> (i32, i32) {
    %c0_i32 = arith.constant 0 : i32
    %c0_i32_0 = arith.constant 0 : i32
    %c0_i32_1 = arith.constant 0 : i32
    return %c0_i32, %c0_i32_0 : i32, i32
  }
  func.func @transform_13(%arg0: i32) -> (i32, i32) {
    %c0_i32 = arith.constant 0 : i32
    %c0_i32_0 = arith.constant 0 : i32
    %c0_i32_1 = arith.constant 0 : i32
    return %c0_i32, %c0_i32_0 : i32, i32
  }
  func.func @transform_14(%arg0: i32) -> (i32, i32) {
    %c0_i32 = arith.constant 0 : i32
    %c0_i32_0 = arith.constant 0 : i32
    %c0_i32_1 = arith.constant 0 : i32
    return %c0_i32, %c0_i32_0 : i32, i32
  }
  func.func @transform_15(%arg0: i32) -> (i32, i32) {
    %c0_i32 = arith.constant 0 : i32
    %c0_i32_0 = arith.constant 0 : i32
    %c0_i32_1 = arith.constant 0 : i32
    return %c0_i32, %c0_i32_0 : i32, i32
  }
  func.func @transform_16(%arg0: i32) -> (i32, i32) {
    %c0_i32 = arith.constant 0 : i32
    %c0_i32_0 = arith.constant 0 : i32
    %c0_i32_1 = arith.constant 0 : i32
    return %c0_i32, %c0_i32_0 : i32, i32
  }
  func.func @transform_17(%arg0: i32) -> (i32, i32) {
    %c0_i32 = arith.constant 0 : i32
    %c0_i32_0 = arith.constant 0 : i32
    %c0_i32_1 = arith.constant 0 : i32
    return %c0_i32, %c0_i32_0 : i32, i32
  }
  func.func @transform_18(%arg0: i32) -> (i32, i32) {
    %c0_i32 = arith.constant 0 : i32
    %c0_i32_0 = arith.constant 0 : i32
    %c0_i32_1 = arith.constant 0 : i32
    return %c0_i32, %c0_i32_0 : i32, i32
  }
  func.func @transform_19(%arg0: i32) -> (i32, i32) {
    %c0_i32 = arith.constant 0 : i32
    %c0_i32_0 = arith.constant 0 : i32
    %c0_i32_1 = arith.constant 0 : i32
    return %c0_i32, %c0_i32_0 : i32, i32
  }
  func.func @transform_20(%arg0: i32) -> (i32, i32) {
    %c0_i32 = arith.constant 0 : i32
    %c0_i32_0 = arith.constant 0 : i32
    %c0_i32_1 = arith.constant 0 : i32
    return %c0_i32, %c0_i32_0 : i32, i32
  }
  func.func @transform_21(%arg0: i32) -> (i32, i32) {
    %c0_i32 = arith.constant 0 : i32
    %c0_i32_0 = arith.constant 0 : i32
    %c0_i32_1 = arith.constant 0 : i32
    return %c0_i32, %c0_i32_0 : i32, i32
  }
  func.func @transform_22(%arg0: i32) -> (i32, i32) {
    %c0_i32 = arith.constant 0 : i32
    %c0_i32_0 = arith.constant 0 : i32
    %c0_i32_1 = arith.constant 0 : i32
    return %c0_i32, %c0_i32_0 : i32, i32
  }
  func.func @transform_23(%arg0: i32) -> (i32, i32) {
    %c0_i32 = arith.constant 0 : i32
    %c0_i32_0 = arith.constant 0 : i32
    %c0_i32_1 = arith.constant 0 : i32
    return %c0_i32, %c0_i32_0 : i32, i32
  }
  func.func @transform_24(%arg0: i32) -> (i32, i32, i32) {
    %c0_i32 = arith.constant 0 : i32
    %c0_i32_0 = arith.constant 0 : i32
    %c0_i32_1 = arith.constant 0 : i32
    return %arg0, %c0_i32, %c0_i32_0 : i32, i32, i32
  }
}

</mosaic_0001>

<bundles_post_ra>
// kernel: _forward_greedy.1
= control target key start
LH: loop header
LB: loop body
LE: loop exit
PB: predicated region body
PF: predicated region fallthrough
CT: control target
= control target key end

     0   :  { %s1251_s25 = smov 0   ;;  %s1421_s0 = inlined_call_operand.vmem [shape: f32[2,8,32], index: 0, kind: input, shape index: {}]   ;;  %s1422_s1 = inlined_call_operand.vmem [shape: f32[32,96], index: 1, kind: input, shape index: {}]   ;;  %s1423_s2 = inlined_call_operand.vmem [shape: f32[1,96], index: 2, kind: input, shape index: {}]   ;;  %s1424_s3 = inlined_call_operand.vmem [shape: f32[32,32], index: 3, kind: input, shape index: {}]   ;;  %s1425_s4 = inlined_call_operand.vmem [shape: f32[1,32], index: 4, kind: input, shape index: {}]   ;;  %s1426_s5 = inlined_call_operand.vmem [shape: f32[1,32], index: 5, kind: input, shape index: {}]   ;;  %s1427_s6 = inlined_call_operand.vmem [shape: f32[1,32], index: 6, kind: input, shape index: {}]   ;;  %s1428_s7 = inlined_call_operand.vmem [shape: f32[32,64], index: 7, kind: input, shape index: {}]   ;;  %s1429_s8 = inlined_call_operand.vmem [shape: f32[1,64], index: 8, kind: input, shape index: {}]   ;;  %s1430_s9 = inlined_call_operand.vmem [shape: f32[64,32], index: 9, kind: input, shape index: {}]   ;;  %s1431_s10 = inlined_call_operand.vmem [shape: f32[1,32], index: 10, kind: input, shape index: {}]   ;;  %s1432_s11 = inlined_call_operand.vmem [shape: f32[1,32], index: 11, kind: input, shape index: {}]   ;;  %s1433_s12 = inlined_call_operand.vmem [shape: f32[1,32], index: 12, kind: input, shape index: {}]   ;;  %s1434_s13 = inlined_call_operand.vmem [shape: f32[2,8,32], index: 13, kind: output, shape index: {}]  }
   0x1 LB: > { %s1083_s26 = sadd.s32 4294967295, %s1167_s25   ;;  %p1087_p0 = scmp.ge.s32.totalorder %s1167_s25, 1  ;;  %s1167_s25 = sphi %s1251_s25, %s23_s25  }
   0x2   : > { %p386_p1 = scmp.lt.s32.totalorder %s1167_s25, 3 }
   0x4   : > { %p387_p2 = pnand %p1087_p0, %p386_p1 }
   0x5   : > { %p428_p3 = scmp.lt.s32.totalorder (!%p387_p2), %s1083_s26, 1  ;;  %s1169_s24 = smov (!%p387_p2), 88  }
   0x6   : > { %390 = sbr.rel (%p387_p2) target bundleno = 2271 (0x8df), region = 72  ;;  %s1170_s27 = smov (!%p387_p2), 96  }
   0x7   : > { %s1171_s28 = smov (!%p387_p2), 120   ;;  %s1172_s29 = smov (!%p387_p2), 72  }
   0x8   : > { %s1173_s30 = smov (!%p387_p2), 104   ;;  %s1174_s14 = smov (!%p387_p2), 80  }
   0x9   : > { %s1175_s17 = smov (!%p387_p2), 56   ;;  %s1176_s19 = smov (!%p387_p2), 64  }
   0xa   : > { %s1177_s20 = smov (!%p387_p2), 112   ;;  %s1179_s22 = smov (!%p387_p2), 48  }
   0xb   : > { %v440_v0 = vld [vmem:[%s1422_s1 + $0x18] sm:$0xff]  ;;  %v439_v1 = vld [vmem:[%s1422_s1 + $0x10] sm:$0xff]  ;;  %v438_v2 = vld [vmem:[%s1422_s1 + $0x8] sm:$0xff]  ;;  %s1436_s26 = smov (!%p428_p3, %s1083_s26), 1  ;;  %vm445_vm0 = vcmask 261120   ;;  %vm477_vm1 = vcmask 64512  }
   0xc   : > { %461 = vmatpush.msra.mxu0 %v440_v0  ;;  %v437_v3 = vld [vmem:[%s1422_s1] sm:$0xff]  ;;  %s1088_s18 = sshll.u32 %s1436_s26, 3 }
   0xd   : > { %s431_s21 = scalar_lea.vmem %s1421_s0, %s1088_s18  ;;  %v1131_v5 = vld [vmem:[%s1423_s2] ss:$0 sm:$0xff] }
   0xe   : > { %462 = vmatpush.msra.mxu0 %v439_v1  ;;  %v1279_v4 = vld [vmem:[%s431_s21] sm:$0xff]  ;;  %s1178_s21 = smov 40  }
   0xf   : > { %v469_v8 = vld [vmem:[%s1424_s3] sm:$0xff] }
  0x10   : > { %463 = vmatpush.msra.mxu0 %v438_v2  ;;  %673 = vmatpush.msra.mxu3 %v469_v8 }
  0x12   : > { %464 = vmatpush.msra.mxu0 %v437_v3 }
  0x13   : > { %1090 = vmatmul.msk.f32.vlgmr.msra.gmra.mxu0 %vm445_vm0, %v1279_v4 }
  0x90   : > { %v466_v6 = vpop.f32.mrf.mxu0 }
  0x91   : > { %v1286_v7 = vadd.f32 %v1131_v5, %v466_v6 }
  0x93   : > { %555 = vrot.lane.b32.xlu2 %v1286_v7, %s1169_s24  ;;  %475 = vrot.lane.b32.xlu0 %v1286_v7, %s1170_s27 }
  0x9b   : > { %553 = vrot.lane.b32.xlu2 %v1286_v7, %s1171_s28 }
  0xa3   : > { %783 = vrot.lane.b32.xlu2 %v1286_v7, %s1172_s29  ;;  %s435_s29 = scalar_lea.vmem %s1434_s13, %s1088_s18 }
  0xab   : > { %781 = vrot.lane.b32.xlu2 %v1286_v7, %s1173_s30 }
  0xb3   : > { %680 = vrot.lane.b32.xlu2 %v1286_v7, %s1174_s14 }
  0xed   : > { %v556_v9 = vpop.permute.xlu2 %555 }
  0xee   : > { %1094 = vmatpush.xpose.msk.msrb.mxu0 %vm477_vm1, %v556_v9 }
  0xf5   : > { %v554_v10 = vpop.permute.xlu2 %553 }
  0xf6   : > { %1095 = vmatmul.msk.f32.vlgmr.msrb.gmra.mxu0 %vm477_vm1, %v554_v10 }
  0xfd   : > { %v784_v11 = vpop.permute.xlu2 %783 }
  0xfe   : > { %1103 = vmatpush.xpose.msk.msrb.mxu3 %vm477_vm1, %v784_v11 }
 0x105   : > { %v782_v12 = vpop.permute.xlu2 %781  ;;  %v476_v13 = vpop.permute.xlu0 %475 }
 0x106   : > { %1091 = vmatpush.xpose.msk.msra.mxu1 %vm477_vm1, %v476_v13 }
 0x109   : > { %1092 = vmatmul.msk.f32.vlgmr.msra.gmra.mxu1 %vm477_vm1, %v1286_v7 }
 0x10d   : > { %v681_v14 = vpop.permute.xlu2 %680 }
 0x10e   : > { %1099 = vmatpush.xpose.msk.msra.mxu0 %vm477_vm1, %v681_v14 }
 0x173   : > { %v578_v15 = vpop.f32.mrf.mxu0 }
 0x174   : > { %v581_v16 = vmul.f32 0.35355338, %v578_v15 }
 0x176   : > { %v582_v17 = vsel %vm477_vm1, %v581_v16, -inf }
 0x177   : > { %583 = vmax.xlane.f32.xlu2 %v582_v17 }
 0x186   : > { %v499_v18 = vpop.f32.mrf.mxu1 }
 0x187   : > { %v502_v19 = vmul.f32 0.35355338, %v499_v18  ;;  %v470_v18 = vld [vmem:[%s1424_s3 + $0x8] sm:$0xff] }
 0x188   : > { %650 = vmatpush.msrb.mxu1 %v470_v18 }
 0x189   : > { %v503_v20 = vsel %vm477_vm1, %v502_v19, -inf }
 0x18a   : > { %504 = vmax.xlane.f32.xlu0 %v503_v20 }
 0x18f   : > { %606 = vrot.lane.b32.xlu2 %v1286_v7, %s1175_s17 }
 0x1ea   : > { %v584_v33 = vpop.xlane.xlu2 %583 }
 0x1eb   : > { %v585_v47 = vsub.f32 %v581_v16, %v584_v33 }
 0x1ed   : > { %v586_v49 = vmul.f32 1.442695, %v585_v47 }
 0x1f2   : > { %v607_v40 = vpop.permute.xlu2 %606 }
 0x1fd   : > { %v505_v21 = vpop.xlane.xlu0 %504 }
 0x1fe   : > { %v506_v22 = vsub.f32 %v502_v19, %v505_v21 }
 0x200   : > { %v507_v23 = vmul.f32 1.442695, %v506_v22 }
 0x202   : > { %1139 = vpow2.f32 %v507_v23 }
 0x208   : > { %v1140_v24 = vpop.eup %1139 }
 0x209   : > { %v509_v25 = vsel %vm477_vm1, %v1140_v24, 0.0 }
 0x20a   : > { %510 = vadd.xlane.f32.xlu1 %v509_v25 }
 0x223   : > { %527 = vrot.lane.b32.xlu1 %v1286_v7, %s1176_s19 }
 0x22b   : > { %678 = vrot.lane.b32.xlu1 %v1286_v7, %s1177_s20 }
 0x27d   : > { %v511_v26 = vpop.xlane.xlu1 %510 }
 0x27e   : > { %1141 = vrcp.f32 %v511_v26  ;;  %v523_v32 = vand.u32 2147483648, %v511_v26  ;;  %vm517_vm3 = vweird.f32 %v511_v26  ;;  %v521_v34 = vand.u32 2147483647, %v511_v26 }
 0x27f   : > { %1143 = vpow2.f32 %v586_v49 }
 0x280   : > { %v524_v36 = vor.u32 1.1754944e-38, %v523_v32  ;;  %vm522_vm5 = vcmp.eq.f32.partialorder %v521_v34, 8.507059e+37 }
 0x284   : > { %v1142_v27 = vpop.eup %1141 }
 0x285   : > { %v513_v28 = vmul.f32 %v1142_v27, %v511_v26  ;;  %vm518_vm2 = vweird.f32 %v1142_v27  ;;  %v1144_v56 = vpop.eup %1143 }
 0x286   : > { %vm519_vm4 = vmor %vm517_vm3, %vm518_vm2  ;;  %v588_v57 = vsel %vm477_vm1, %v1144_v56, 0.0 }
 0x287   : > { %v514_v29 = vsub.f32 1.0, %v513_v28 }
 0x289   : > { %v515_v30 = vmul.f32 %v1142_v27, %v514_v29 }
 0x28b   : > { %v516_v31 = vadd.f32 %v1142_v27, %v515_v30 }
 0x28d   : > { %v520_v35 = vsel %vm519_vm4, %v1142_v27, %v516_v31 }
 0x28e   : > { %v525_v37 = vsel %vm522_vm5, %v524_v36, %v520_v35 }
 0x28f   : > { %v526_v39 = vmul.f32 %v1140_v24, %v525_v37 }
 0x295   : > { %v528_v38 = vpop.permute.xlu1 %527 }
 0x296   : > { %548 = vmatpush.msra.mxu2 %v528_v38 }
 0x297   : > { %1093 = vmatmul.msk.f32.vlgmr.msra.gmra.mxu2 %vm477_vm1, %v526_v39 }
 0x298   : > { %627 = vmatpush.msrb.mxu2 %v607_v40 }
 0x29d   : > { %v679_v41 = vpop.permute.xlu1 %678 }
 0x29e   : > { %1100 = vmatmul.msk.f32.vlgmr.msra.gmra.mxu0 %vm477_vm1, %v679_v41  ;;  %v472_v41 = vld [vmem:[%s1424_s3 + $0x18] sm:$0xff] }
 0x31a   : > { %v550_v42 = vpop.f32.mrf.mxu2 }
 0x31b   : > { %1098 = vmatmul.msk.f32.vlgmr.msra.gmra.mxu3 %vm477_vm1, %v550_v42  ;;  %v703_v43 = vpop.f32.mrf.mxu0  ;;  %v471_v42 = vld [vmem:[%s1424_s3 + $0x10] sm:$0xff] }
 0x31c   : > { %v706_v44 = vmul.f32 0.35355338, %v703_v43  ;;  %775 = vmatpush.msra.mxu1 %v471_v42 }
 0x31e   : > { %v707_v45 = vsel %vm477_vm1, %v706_v44, -inf }
 0x31f   : > { %708 = vmax.xlane.f32.xlu1 %v707_v45 }
 0x323   : > { %1104 = vmatmul.msk.f32.vlgmr.msrb.gmra.mxu3 %vm477_vm1, %v782_v12 }
 0x338   : > { %834 = vrot.lane.b32.xlu1 %v1286_v7, %s1178_s21 }
 0x392   : > { %v709_v48 = vpop.xlane.xlu1 %708 }
 0x393   : > { %v710_v52 = vsub.f32 %v706_v44, %v709_v48 }
 0x395   : > { %v711_v55 = vmul.f32 1.442695, %v710_v52 }
 0x397   : > { %1145 = vpow2.f32 %v711_v55 }
 0x39d   : > { %v1320_v58 = vpop.eup %1145 }
 0x39e   : > { %v1316_v46 = vpop.f32.mrf.mxu3  ;;  %v713_v59 = vsel %vm477_vm1, %v1320_v58, 0.0 }
 0x3a6   : > { %v806_v50 = vpop.f32.mrf.mxu3 }
 0x3a7   : > { %v809_v51 = vmul.f32 0.35355338, %v806_v50  ;;  %v1132_v50 = vld [vmem:[%s1425_s4] ss:$0 sm:$0xff] }
 0x3a9   : > { %v810_v53 = vsel %vm477_vm1, %v809_v51, -inf }
 0x3aa   : > { %811 = vmax.xlane.f32.xlu0 %v810_v53  ;;  %v835_v54 = vpop.permute.xlu1 %834 }
 0x3ab   : > { %855 = vmatpush.msrb.mxu0 %v835_v54 }
 0x3b2   : > { %589 = vadd.xlane.f32.xlu0 %v588_v57 }
 0x3ba   : > { %714 = vadd.xlane.f32.xlu0 %v713_v59 }
 0x41d   : > { %v812_v60 = vpop.xlane.xlu0 %811 }
 0x41e   : > { %v813_v61 = vsub.f32 %v809_v51, %v812_v60 }
 0x420   : > { %v814_v62 = vmul.f32 1.442695, %v813_v61 }
 0x422   : > { %1147 = vpow2.f32 %v814_v62 }
 0x425   : > { %v590_v63 = vpop.xlane.xlu0 %589 }
 0x426   : > { %1149 = vrcp.f32 %v590_v63  ;;  %v602_v6 = vand.u32 2147483648, %v590_v63  ;;  %v600_v9 = vand.u32 2147483647, %v590_v63  ;;  %vm596_vm7 = vweird.f32 %v590_v63 }
 0x428   : > { %v1148_v0 = vpop.eup %1147  ;;  %v603_v11 = vor.u32 1.1754944e-38, %v602_v6  ;;  %vm601_vm9 = vcmp.eq.f32.partialorder %v600_v9, 8.507059e+37  ;;  %v928_v6 = vld [vmem:[%s1428_s7] sm:$0xff]  ;;  %v966_v9 = vld [vmem:[%s1430_s9 + $0x30] sm:$0xff] }
 0x429   : > { %v816_v1 = vsel %vm477_vm1, %v1148_v0, 0.0 }
 0x42a   : > { %817 = vadd.xlane.f32.xlu0 %v816_v1 }
 0x42c   : > { %v1150_v2 = vpop.eup %1149 }
 0x42d   : > { %v592_v3 = vmul.f32 %v1150_v2, %v590_v63  ;;  %vm597_vm6 = vweird.f32 %v1150_v2  ;;  %v715_v15 = vpop.xlane.xlu0 %714 }
 0x42e   : > { %vm598_vm8 = vmor %vm596_vm7, %vm597_vm6  ;;  %1151 = vrcp.f32 %v715_v15  ;;  %v727_v25 = vand.u32 2147483648, %v715_v15  ;;  %vm721_vm11 = vweird.f32 %v715_v15  ;;  %vm972_vm7 = vcmask 523264  }
 0x42f   : > { %v593_v5 = vsub.f32 1.0, %v592_v3  ;;  %v930_v3 = vld [vmem:[%s1428_s7 + $0x10] sm:$0xff] }
 0x430   : > { %v728_v31 = vor.u32 1.1754944e-38, %v727_v25  ;;  %v1134_v25 = vld [vmem:[%s1427_s6] ss:$0 sm:$0xff] }
 0x431   : > { %v594_v8 = vmul.f32 %v1150_v2, %v593_v5  ;;  %v929_v5 = vld [vmem:[%s1428_s7 + $0x8] sm:$0xff] }
 0x433   : > { %v595_v10 = vadd.f32 %v1150_v2, %v594_v8  ;;  %v967_v8 = vld [vmem:[%s1430_s9 + $0x38] sm:$0xff] }
 0x434   : > { %v1152_v16 = vpop.eup %1151  ;;  %984 = vmatpush.msra.mxu3 %v967_v8 }
 0x435   : > { %v599_v12 = vsel %vm598_vm8, %v1150_v2, %v595_v10  ;;  %v717_v17 = vmul.f32 %v1152_v16, %v715_v15  ;;  %vm722_vm10 = vweird.f32 %v1152_v16  ;;  %v931_v2 = vld [vmem:[%s1428_s7 + $0x18] sm:$0xff]  ;;  %v965_v10 = vld [vmem:[%s1430_s9 + $0x28] sm:$0xff] }
 0x436   : > { %v604_v13 = vsel %vm601_vm9, %v603_v11, %v599_v12  ;;  %vm723_vm12 = vmor %vm721_vm11, %vm722_vm10  ;;  %985 = vmatpush.msra.mxu3 %v966_v9 }
 0x437   : > { %v605_v14 = vmul.f32 %v1144_v56, %v604_v13  ;;  %v718_v20 = vsub.f32 1.0, %v717_v17  ;;  %v1180_v56 = vmov 32.0   ;;  %v964_v13 = vld [vmem:[%s1430_s9 + $0x20] sm:$0xff] }
 0x438   : > { %986 = vmatpush.msra.mxu3 %v965_v10 }
 0x439   : > { %1096 = vmatmul.msk.f32.vlgmr.msrb.gmra.mxu2 %vm477_vm1, %v605_v14  ;;  %v719_v21 = vmul.f32 %v1152_v16, %v718_v20 }
 0x43a   : > { %987 = vmatpush.msra.mxu3 %v964_v13 }
 0x43b   : > { %v720_v24 = vadd.f32 %v1152_v16, %v719_v21 }
 0x43d   : > { %v724_v30 = vsel %vm723_vm12, %v1152_v16, %v720_v24 }
 0x43e   : > { %731 = vrot.lane.b32.xlu0 %v1286_v7, %s1179_s22  ;;  %v725_v7 = vand.u32 2147483647, %v715_v15  ;;  %v963_v15 = vld [vmem:[%s1430_s9 + $0x18] sm:$0xff] }
 0x43f   : > { %988 = vmatpush.msra.mxu3 %v963_v15 }
 0x440   : > { %vm726_vm15 = vcmp.eq.f32.partialorder %v725_v7, 8.507059e+37 }
 0x441   : > { %v729_v34 = vsel %vm726_vm15, %v728_v31, %v724_v30  ;;  %v1135_v30 = vld [vmem:[%s1429_s8] ss:$0 sm:$0xff] }
 0x442   : > { %v730_v39 = vmul.f32 %v1320_v58, %v729_v34  ;;  %v1136_v34 = vld [vmem:[%s1431_s10] ss:$0 sm:$0xff] }
 0x49d   : > { %v818_v19 = vpop.xlane.xlu0 %817 }
 0x49e   : > { %1153 = vrcp.f32 %v818_v19  ;;  %v830_v27 = vand.u32 2147483648, %v818_v19  ;;  %v828_v29 = vand.u32 2147483647, %v818_v19  ;;  %vm824_vm14 = vweird.f32 %v818_v19 }
 0x49f   : > { %1155 = vrcp.f32 %v1180_v56  ;;  %v1138_v56 = vld [vmem:[%s1433_s12] ss:$0 sm:$0xff] }
 0x4a0   : > { %v831_v33 = vor.u32 1.1754944e-38, %v830_v27  ;;  %vm829_vm3 = vcmp.eq.f32.partialorder %v828_v29, 8.507059e+37  ;;  %v962_v27 = vld [vmem:[%s1430_s9 + $0x10] sm:$0xff]  ;;  %v960_v29 = vld [vmem:[%s1430_s9] sm:$0xff] }
 0x4a1   : > { %989 = vmatpush.msra.mxu3 %v962_v27 }
 0x4a4   : > { %v1154_v22 = vpop.eup %1153 }
 0x4a5   : > { %v820_v23 = vmul.f32 %v1154_v22, %v818_v19  ;;  %vm825_vm13 = vweird.f32 %v1154_v22  ;;  %v1156_v57 = vpop.eup %1155 }
 0x4a6   : > { %vm826_vm2 = vmor %vm824_vm14, %vm825_vm13  ;;  %v895_v58 = vmul.f32 32.0, %v1156_v57 }
 0x4a7   : > { %v821_v26 = vsub.f32 1.0, %v820_v23 }
 0x4a8   : > { %v896_v59 = vsub.f32 1.0, %v895_v58 }
 0x4a9   : > { %v822_v28 = vmul.f32 %v1154_v22, %v821_v26 }
 0x4ab   : > { %v823_v32 = vadd.f32 %v1154_v22, %v822_v28  ;;  %v961_v28 = vld [vmem:[%s1430_s9 + $0x8] sm:$0xff] }
 0x4ac   : > { %990 = vmatpush.msra.mxu3 %v961_v28 }
 0x4ad   : > { %v827_v35 = vsel %vm826_vm2, %v1154_v22, %v823_v32  ;;  %v1133_v22 = vld [vmem:[%s1426_s5] ss:$0 sm:$0xff] }
 0x4ae   : > { %v832_v36 = vsel %vm829_vm3, %v831_v33, %v827_v35  ;;  %991 = vmatpush.msra.mxu3 %v960_v29 }
 0x4af   : > { %v833_v37 = vmul.f32 %v1148_v0, %v832_v36 }
 0x4b0   : > { %v732_v38 = vpop.permute.xlu0 %731 }
 0x4b1   : > { %752 = vmatpush.msra.mxu2 %v732_v38  ;;  %1105 = vmatmul.msk.f32.vlgmr.msrb.gmra.mxu0 %vm477_vm1, %v833_v37 }
 0x4b2   : > { %1101 = vmatmul.msk.f32.vlgmr.msra.gmra.mxu2 %vm477_vm1, %v730_v39 }
 0x4b3   : > { %878 = vmatpush.msrb.mxu2 %v472_v41 }
 0x4bc   : > { %v629_v40 = vpop.f32.mrf.mxu2 }
 0x4bd   : > { %1097 = vmatmul.msk.f32.vlgmr.msrb.gmra.mxu1 %vm477_vm1, %v629_v40 }
 0x4be   : > { %951 = vmatpush.msrb.mxu1 %v931_v2 }
 0x4c0   : > { %952 = vmatpush.msrb.mxu1 %v930_v3 }
 0x4c2   : > { %953 = vmatpush.msrb.mxu1 %v929_v5 }
 0x4c4   : > { %954 = vmatpush.msrb.mxu1 %v928_v6 }
 0x52e   : > { %v857_v43 = vpop.f32.mrf.mxu0 }
 0x52f   : > { %1106 = vmatmul.msk.f32.vlgmr.msrb.gmra.mxu2 %vm477_vm1, %v857_v43 }
 0x535   : > { %v754_v44 = vpop.f32.mrf.mxu2 }
 0x536   : > { %1102 = vmatmul.msk.f32.vlgmr.msra.gmra.mxu1 %vm477_vm1, %v754_v44  ;;  %vm899_vm1 = vweird.f32 %v1156_v57 }
 0x53a   : > { %v652_v45 = vpop.f32.mrf.mxu1 }
 0x53b   : > { %v676_v47 = vadd.f32 %v1316_v46, %v652_v45  ;;  %v897_v46 = vmul.f32 %v1156_v57, %v896_v59 }
 0x53d   : > { %v898_v60 = vadd.f32 %v1156_v57, %v897_v46 }
 0x53f   : > { %v1348_v61 = vsel %vm899_vm1, %v1156_v57, %v898_v60 }
 0x5b2   : > { %v880_v51 = vpop.f32.mrf.mxu2 }
 0x5b3   : > { %v777_v48 = vpop.f32.mrf.mxu1 }
 0x5b4   : > { %v780_v49 = vadd.f32 %v777_v48, %v676_v47 }
 0x5b6   : > { %v883_v52 = vadd.f32 %v880_v51, %v780_v49 }
 0x5b8   : > { %v887_v53 = vadd.f32 %v1132_v50, %v883_v52 }
 0x5ba   : > { %v888_v54 = vadd.f32 %v887_v53, %v1279_v4 }
 0x5bc   : > { %v891_v55 = vsel %vm445_vm0, %v888_v54, 0.0 }
 0x5bd   : > { %892 = vadd.xlane.f32.xlu0 %v891_v55 }
 0x630   : > { %v893_v62 = vpop.xlane.xlu0 %892 }
 0x631   : > { %v901_v63 = vmul.f32 %v1348_v61, %v893_v62 }
 0x633   : > { %v902_v0 = vsub.f32 %v888_v54, %v901_v63  ;;  %v1137_v54 = vld [vmem:[%s1432_s11] ss:$0 sm:$0xff] }
 0x635   : > { %v903_v1 = vmul.f32 %v902_v0, %v902_v0 }
 0x637   : > { %v904_v4 = vsel %vm445_vm0, %v903_v1, 0.0 }
 0x638   : > { %905 = vadd.xlane.f32.xlu2 %v904_v4 }
 0x6ab   : > { %v906_v11 = vpop.xlane.xlu2 %905 }
 0x6ac   : > { %v907_v12 = vmul.f32 %v906_v11, %v1348_v61 }
 0x6ae   : > { %v908_v14 = vadd.f32 1e-05, %v907_v12 }
 0x6b0   : > { %1157 = vrsqrt.f32 %v908_v14  ;;  %vm915_vm5 = vweird.f32 %v908_v14 }
 0x6b6   : > { %v1158_v16 = vpop.eup %1157 }
 0x6b7   : > { %v910_v17 = vmul.f32 %v1158_v16, %v908_v14  ;;  %vm916_vm4 = vweird.f32 %v1158_v16 }
 0x6b8   : > { %vm917_vm6 = vmor %vm915_vm5, %vm916_vm4 }
 0x6b9   : > { %v911_v18 = vmul.f32 %v1158_v16, %v910_v17 }
 0x6bb   : > { %v912_v19 = vmul.f32 0.5, %v911_v18 }
 0x6bd   : > { %v913_v20 = vsub.f32 1.5, %v912_v19 }
 0x6bf   : > { %v914_v21 = vmul.f32 %v1158_v16, %v913_v20 }
 0x6c1   : > { %v918_v23 = vsel %vm917_vm6, %v1158_v16, %v914_v21 }
 0x6c2   : > { %v919_v24 = vmul.f32 %v918_v23, %v902_v0 }
 0x6c4   : > { %v923_v26 = vmul.f32 %v1133_v22, %v919_v24 }
 0x6c6   : > { %v927_v7 = vadd.f32 %v1134_v25, %v923_v26 }
 0x6c8   : > { %1107 = vmatmul.msk.f32.vlgmr.msrb.gmra.mxu1 %vm445_vm0, %v927_v7 }
 0x745   : > { %v956_v31 = vpop.f32.mrf.mxu1 }
 0x746   : > { %v957_v32 = vadd.f32 %v1135_v30, %v956_v31 }
 0x748   : > { %v959_v33 = vmax.f32 %v957_v32, 0.0 }
 0x74a   : > { %1108 = vmatmul.msk.f32.vlgmr.msra.gmra.mxu3 %vm972_vm7, %v959_v33 }
 0x7cd   : > { %v993_v35 = vpop.f32.mrf.mxu3 }
 0x7ce   : > { %v994_v36 = vadd.f32 %v1136_v34, %v993_v35 }
 0x7d0   : > { %v996_v37 = vadd.f32 %v994_v36, %v927_v7 }
 0x7d2   : > { %v999_v38 = vsel %vm445_vm0, %v996_v37, 0.0 }
 0x7d3   : > { %1000 = vadd.xlane.f32.xlu1 %v999_v38 }
 0x846   : > { %v1001_v39 = vpop.xlane.xlu1 %1000 }
 0x847   : > { %v1002_v40 = vmul.f32 %v1001_v39, %v1348_v61 }
 0x849   : > { %v1003_v41 = vsub.f32 %v996_v37, %v1002_v40 }
 0x84b   : > { %v1004_v42 = vmul.f32 %v1003_v41, %v1003_v41 }
 0x84d   : > { %v1005_v43 = vsel %vm445_vm0, %v1004_v42, 0.0 }
 0x84e   : > { %1006 = vadd.xlane.f32.xlu0 %v1005_v43 }
 0x8c1   : > { %v1007_v44 = vpop.xlane.xlu0 %1006 }
 0x8c2   : > { %v1008_v45 = vmul.f32 %v1007_v44, %v1348_v61 }
 0x8c4   : > { %v1009_v47 = vadd.f32 1e-05, %v1008_v45 }
 0x8c6   : > { %1159 = vrsqrt.f32 %v1009_v47  ;;  %vm1016_vm9 = vweird.f32 %v1009_v47 }
 0x8cc   : > { %v1160_v48 = vpop.eup %1159 }
 0x8cd   : > { %v1011_v49 = vmul.f32 %v1160_v48, %v1009_v47  ;;  %vm1017_vm8 = vweird.f32 %v1160_v48 }
 0x8ce   : > { %vm1018_vm10 = vmor %vm1016_vm9, %vm1017_vm8 }
 0x8cf   : > { %v1012_v50 = vmul.f32 %v1160_v48, %v1011_v49 }
 0x8d1   : > { %v1013_v51 = vmul.f32 0.5, %v1012_v50 }
 0x8d3   : > { %v1014_v52 = vsub.f32 1.5, %v1013_v51 }
 0x8d5   : > { %v1015_v53 = vmul.f32 %v1160_v48, %v1014_v52 }
 0x8d7   : > { %v1019_v55 = vsel %vm1018_vm10, %v1160_v48, %v1015_v53 }
 0x8d8   : > { %v1020_v57 = vmul.f32 %v1019_v55, %v1003_v41 }
 0x8da   : > { %v1024_v58 = vmul.f32 %v1137_v54, %v1020_v57 }
 0x8dc   : > { %v1028_v59 = vadd.f32 %v1138_v56, %v1024_v58 }
 0x8de   : > { %1029 = vst.msk [vmem:[%s435_s29] sm:$0xff] %vm445_vm0, %v1028_v59 }
 0x8df PF: > { %s23_s25 = sadd.s32 1, %s1167_s25  }
 0x8e0   : > { %p20_p4 = scmp.ge.s32.totalorder %s23_s25, 4  }
 0x8e2   :  { %22 = sbr.rel (!%p20_p4) target bundleno = 1 (0x1), region = 102 }

// kernel: body.8
= control target key start
LH: loop header
LB: loop body
LE: loop exit
PB: predicated region body
PF: predicated region fallthrough
CT: control target
= control target key end

     0   :  { %s2542_s0 = inlined_call_operand.vmem [shape: f32[2,8,32], index: 0, kind: input, shape index: {}]   ;;  %s2543_s1 = inlined_call_operand.vmem [shape: f32[2,8,32], index: 1, kind: input, shape index: {}]   ;;  %s2544_s2 = inlined_call_operand.vmem [shape: f32[32,96], index: 2, kind: input, shape index: {}]   ;;  %s2545_s3 = inlined_call_operand.vmem [shape: f32[1,96], index: 3, kind: input, shape index: {}]   ;;  %s2546_s4 = inlined_call_operand.vmem [shape: f32[32,32], index: 4, kind: input, shape index: {}]   ;;  %s2547_s5 = inlined_call_operand.vmem [shape: f32[1,32], index: 5, kind: input, shape index: {}]   ;;  %s2548_s6 = inlined_call_operand.vmem [shape: f32[1,32], index: 6, kind: input, shape index: {}]   ;;  %s2549_s7 = inlined_call_operand.vmem [shape: f32[1,32], index: 7, kind: input, shape index: {}]   ;;  %s2550_s8 = inlined_call_operand.vmem [shape: f32[32,32], index: 8, kind: input, shape index: {}]   ;;  %s2551_s9 = inlined_call_operand.vmem [shape: f32[1,32], index: 9, kind: input, shape index: {}]   ;;  %s2552_s10 = inlined_call_operand.vmem [shape: f32[32,64], index: 10, kind: input, shape index: {}]   ;;  %s2553_s11 = inlined_call_operand.vmem [shape: f32[1,64], index: 11, kind: input, shape index: {}]   ;;  %s2554_s12 = inlined_call_operand.vmem [shape: f32[32,32], index: 12, kind: input, shape index: {}]   ;;  %s2555_s13 = inlined_call_operand.vmem [shape: f32[1,32], index: 13, kind: input, shape index: {}]   ;;  %s2556_s14 = inlined_call_operand.vmem [shape: f32[1,32], index: 14, kind: input, shape index: {}]   ;;  %s2557_s15 = inlined_call_operand.vmem [shape: f32[1,32], index: 15, kind: input, shape index: {}]   ;;  %s2558_s16 = inlined_call_operand.vmem [shape: f32[32,64], index: 16, kind: input, shape index: {}]   ;;  %s2559_s17 = inlined_call_operand.vmem [shape: f32[1,64], index: 17, kind: input, shape index: {}]   ;;  %s2560_s18 = inlined_call_operand.vmem [shape: f32[64,32], index: 18, kind: input, shape index: {}]   ;;  %s2561_s19 = inlined_call_operand.vmem [shape: f32[1,32], index: 19, kind: input, shape index: {}]   ;;  %s2562_s20 = inlined_call_operand.vmem [shape: f32[1,32], index: 20, kind: input, shape index: {}]   ;;  %s2563_s21 = inlined_call_operand.vmem [shape: f32[1,32], index: 21, kind: input, shape index: {}]   ;;  %s2564_s22 = inlined_call_operand.vmem [shape: f32[32,128], index: 22, kind: input, shape index: {}]   ;;  %s2565_s23 = inlined_call_operand.vmem [shape: f32[1,128], index: 23, kind: input, shape index: {}]   ;;  %s2566_s24 = inlined_call_operand.vmem [shape: f32[2,8,128], index: 24, kind: output, shape index: {}]  }
   0x1   :  { %2580 = sst [smem:[#allocation2_spill]] %s2542_s0 }
   0x2   :  { %2581 = sst [smem:[#allocation3_spill]] %s2543_s1 }
   0x3   :  { %2582 = sst [smem:[#allocation4_spill]] %s2544_s2 }
   0x4   :  { %2583 = sst [smem:[#allocation5_spill]] %s2545_s3 }
   0x5   :  { %2584 = sst [smem:[#allocation6_spill]] %s2546_s4 }
   0x6   :  { %2585 = sst [smem:[#allocation7_spill]] %s2547_s5  ;;  %s2232_s5 = smov 0  }
   0x7   :  { %2586 = sst [smem:[#allocation8_spill]] %s2548_s6 }
   0x8   :  { %2587 = sst [smem:[#allocation9_spill]] %s2549_s7 }
   0x9   :  { %2588 = sst [smem:[#allocation10_spill]] %s2550_s8 }
   0xa LB: > { %s1963_s26 = sadd.s32 4294967295, %s2092_s5   ;;  %p1967_p0 = scmp.ge.s32.totalorder %s2092_s5, 1  ;;  %s2092_s5 = sphi %s2232_s5, %s34_s5  }
   0xb   : > { %p670_p1 = scmp.lt.s32.totalorder %s2092_s5, 3 }
   0xd   : > { %p671_p2 = pnand %p1967_p0, %p670_p1 }
   0xe   : > { %s2589_s6 = sld [smem:[#allocation4_spill]] (!%p671_p2)  ;;  %p738_p3 = scmp.lt.s32.totalorder (!%p671_p2), %s1963_s26, 1 }
   0xf   : > { %674 = sbr.rel (%p671_p2) target bundleno = 4002 (0xfa2), region = 116  ;;  %s2590_s1 = sld [smem:[#allocation2_spill]] (!%p671_p2) }
  0x10   : > { %s2591_s29 = sld [smem:[#allocation5_spill]] (!%p671_p2)  ;;  %s2579_s0 = smov (!%p671_p2), 96  }
  0x11   : > { %s2573_s7 = smov (!%p671_p2), 120   ;;  %s2570_s30 = smov (!%p671_p2), 72  }
  0x12   : > { %s2577_s3 = smov (!%p671_p2), 104   ;;  %s2571_s8 = smov (!%p671_p2), 80  }
  0x13   : > { %s2101_s4 = smov (!%p671_p2), 64   ;;  %s2592_s2 = sld [smem:[#allocation6_spill]] (!%p671_p2) }
  0x14   : > { %v761_v0 = vld [vmem:[%s2589_s6 + $0x18] sm:$0xff]  ;;  %v760_v1 = vld [vmem:[%s2589_s6 + $0x10] sm:$0xff]  ;;  %v759_v2 = vld [vmem:[%s2589_s6 + $0x8] sm:$0xff]  ;;  %s2606_s26 = smov (!%p738_p3, %s1963_s26), 1  ;;  %vm766_vm0 = vcmask 261120   ;;  %vm798_vm1 = vcmask 64512   ;;  %v752_v14 = vlaneseq }
  0x15   : > { %782 = vmatpush.msra.mxu0 %v761_v0  ;;  %v758_v3 = vld [vmem:[%s2589_s6] sm:$0xff]  ;;  %s2252_s25 = sshll.u32 %s2606_s26, 3  ;;  %s2572_s26 = smov 88   ;;  %v2100_v18 = vmov -1e+09  }
  0x16   : > { %s741_s27 = scalar_lea.vmem %s2590_s1, %s2252_s25  ;;  %v2032_v5 = vld [vmem:[%s2591_s29] ss:$0 sm:$0xff]  ;;  %v753_v15 = vshrl.u32 %v752_v14, 7  ;;  %v755_v16 = vand.u32 127, %v752_v14  ;;  %s2575_s1 = smov 112  }
  0x17   : > { %783 = vmatpush.msra.mxu0 %v760_v1  ;;  %v2258_v4 = vld [vmem:[%s741_s27] sm:$0xff]  ;;  %s2103_s29 = smov 40   ;;  %s2105_s27 = smov 48  }
  0x18   : > { %vm756_vm2 = vcmp.ge.s32.totalorder %v753_v15, %v755_v16  ;;  %s2597_s28 = sld [smem:[#allocation9_spill]] }
  0x19   : > { %784 = vmatpush.msra.mxu0 %v759_v2  ;;  %v2285_v19 = vsel %vm756_vm2, 0.0, %v2100_v18  ;;  %v790_v41 = vld [vmem:[%s2592_s2] sm:$0xff] }
  0x1b   : > { %785 = vmatpush.msra.mxu0 %v758_v3 }
  0x1c   : > { %1971 = vmatmul.msk.f32.vlgmr.msra.gmra.mxu0 %vm766_vm0, %v2258_v4 }
  0x99   : > { %v787_v6 = vpop.f32.mrf.mxu0 }
  0x9a   : > { %v2265_v7 = vadd.f32 %v2032_v5, %v787_v6 }
  0x9c   : > { %877 = vrot.lane.b32.xlu2 %v2265_v7, %s2572_s26  ;;  %796 = vrot.lane.b32.xlu0 %v2265_v7, %s2579_s0  ;;  %s2594_s26 = sld [smem:[#allocation3_spill]] }
  0x9d   : > { %s2595_s0 = sld [smem:[#allocation10_spill]] }
  0xa4   : > { %875 = vrot.lane.b32.xlu2 %v2265_v7, %s2573_s7  ;;  %s745_s7 = scalar_lea.vmem %s2594_s26, %s2252_s25  ;;  %s2602_s26 = smov 88  }
  0xac   : > { %1107 = vrot.lane.b32.xlu2 %v2265_v7, %s2570_s30  ;;  %s2596_s30 = sld [smem:[#allocation8_spill]] }
  0xb4   : > { %1105 = vrot.lane.b32.xlu2 %v2265_v7, %s2577_s3  ;;  %s2598_s3 = smov 96  }
  0xbc   : > { %1003 = vrot.lane.b32.xlu2 %v2265_v7, %s2571_s8  ;;  %s2603_s8 = smov 80  }
  0xf6   : > { %v878_v8 = vpop.permute.xlu2 %877 }
  0xfe   : > { %v876_v9 = vpop.permute.xlu2 %875 }
 0x106   : > { %v1108_v10 = vpop.permute.xlu2 %1107 }
 0x10e   : > { %v2279_v11 = vpop.permute.xlu2 %1105  ;;  %v797_v12 = vpop.permute.xlu0 %796 }
 0x10f   : > { %1972 = vmatpush.xpose.msk.msra.mxu1 %vm798_vm1, %v797_v12 }
 0x112   : > { %1973 = vmatmul.msk.f32.vlgmr.msra.gmra.mxu1 %vm798_vm1, %v2265_v7 }
 0x116   : > { %v1004_v13 = vpop.permute.xlu2 %1003 }
 0x117   : > { %1980 = vmatpush.xpose.msk.msrb.mxu0 %vm798_vm1, %v1004_v13 }
 0x18f   : > { %v820_v17 = vpop.f32.mrf.mxu1 }
 0x190   : > { %v823_v20 = vmul.f32 0.35355338, %v820_v17 }
 0x192   : > { %v824_v21 = vadd.f32 %v823_v20, %v2285_v19 }
 0x194   : > { %v825_v22 = vsel %vm798_vm1, %v824_v21, -inf }
 0x195   : > { %826 = vmax.xlane.f32.xlu0 %v825_v22 }
 0x208   : > { %v827_v23 = vpop.xlane.xlu0 %826 }
 0x209   : > { %v828_v24 = vsub.f32 %v824_v21, %v827_v23 }
 0x20b   : > { %v829_v25 = vmul.f32 1.442695, %v828_v24 }
 0x20d   : > { %2046 = vpow2.f32 %v829_v25 }
 0x213   : > { %v2047_v26 = vpop.eup %2046 }
 0x214   : > { %v831_v27 = vsel %vm798_vm1, %v2047_v26, 0.0 }
 0x215   : > { %832 = vadd.xlane.f32.xlu1 %v831_v27  ;;  %v791_v27 = vld [vmem:[%s2592_s2 + $0x8] sm:$0xff] }
 0x216   : > { %973 = vmatpush.msrb.mxu1 %v791_v27 }
 0x22e   : > { %849 = vrot.lane.b32.xlu1 %v2265_v7, %s2101_s4  ;;  %s2104_s4 = smov 56  }
 0x236   : > { %1001 = vrot.lane.b32.xlu1 %v2265_v7, %s2575_s1  ;;  %s2599_s1 = smov 104  }
 0x288   : > { %v833_v28 = vpop.xlane.xlu1 %832 }
 0x289   : > { %2048 = vrcp.f32 %v833_v28  ;;  %v845_v34 = vand.u32 2147483648, %v833_v28  ;;  %vm839_vm4 = vweird.f32 %v833_v28  ;;  %v843_v35 = vand.u32 2147483647, %v833_v28 }
 0x28b   : > { %v846_v37 = vor.u32 1.1754944e-38, %v845_v34  ;;  %vm844_vm6 = vcmp.eq.f32.partialorder %v843_v35, 8.507059e+37 }
 0x28f   : > { %v2049_v29 = vpop.eup %2048 }
 0x290   : > { %v835_v30 = vmul.f32 %v2049_v29, %v833_v28  ;;  %vm840_vm3 = vweird.f32 %v2049_v29 }
 0x291   : > { %vm841_vm5 = vmor %vm839_vm4, %vm840_vm3 }
 0x292   : > { %v836_v31 = vsub.f32 1.0, %v835_v30 }
 0x294   : > { %v837_v32 = vmul.f32 %v2049_v29, %v836_v31 }
 0x296   : > { %v838_v33 = vadd.f32 %v2049_v29, %v837_v32 }
 0x298   : > { %v842_v36 = vsel %vm841_vm5, %v2049_v29, %v838_v33 }
 0x299   : > { %v847_v38 = vsel %vm844_vm6, %v846_v37, %v842_v36 }
 0x29a   : > { %v848_v40 = vmul.f32 %v2047_v26, %v847_v38 }
 0x2a0   : > { %v850_v39 = vpop.permute.xlu1 %849 }
 0x2a1   : > { %870 = vmatpush.msra.mxu3 %v850_v39 }
 0x2a2   : > { %1974 = vmatmul.msk.f32.vlgmr.msra.gmra.mxu3 %vm798_vm1, %v848_v40 }
 0x2a3   : > { %1975 = vmatpush.xpose.msk.msrb.mxu3 %vm798_vm1, %v878_v8 }
 0x2a7   : > { %996 = vmatpush.msra.mxu3 %v790_v41 }
 0x2a8   : > { %v1002_v42 = vpop.permute.xlu1 %1001 }
 0x2a9   : > { %1981 = vmatmul.msk.f32.vlgmr.msrb.gmra.mxu0 %vm798_vm1, %v1002_v42 }
 0x2aa   : > { %1976 = vmatmul.msk.f32.vlgmr.msrb.gmra.mxu3 %vm798_vm1, %v876_v9 }
 0x2ab   : > { %1984 = vmatpush.xpose.msk.msrb.mxu3 %vm798_vm1, %v1108_v10 }
 0x325   : > { %v872_v43 = vpop.f32.mrf.mxu3 }
 0x326   : > { %1979 = vmatmul.msk.f32.vlgmr.msra.gmra.mxu3 %vm798_vm1, %v872_v43  ;;  %v1026_v44 = vpop.f32.mrf.mxu0 }
 0x327   : > { %v1029_v45 = vmul.f32 0.35355338, %v1026_v44 }
 0x329   : > { %v1030_v46 = vadd.f32 %v1029_v45, %v2285_v19 }
 0x32b   : > { %v1031_v47 = vsel %vm798_vm1, %v1030_v46, -inf }
 0x32c   : > { %1032 = vmax.xlane.f32.xlu1 %v1031_v47 }
 0x32d   : > { %v900_v48 = vpop.f32.mrf.mxu3 }
 0x32e   : > { %v903_v49 = vmul.f32 0.35355338, %v900_v48  ;;  %1985 = vmatmul.msk.f32.vlgmr.msrb.gmra.mxu3 %vm798_vm1, %v2279_v11 }
 0x330   : > { %v904_v50 = vadd.f32 %v903_v49, %v2285_v19 }
 0x332   : > { %v905_v51 = vsel %vm798_vm1, %v904_v50, -inf }
 0x333   : > { %906 = vmax.xlane.f32.xlu2 %v905_v51  ;;  %v792_v51 = vld [vmem:[%s2592_s2 + $0x10] sm:$0xff] }
 0x334   : > { %1099 = vmatpush.msra.mxu1 %v792_v51 }
 0x345   : > { %1159 = vrot.lane.b32.xlu1 %v2265_v7, %s2103_s29 }
 0x34b   : > { %929 = vrot.lane.b32.xlu2 %v2265_v7, %s2104_s4  ;;  %s2601_s4 = smov 120  }
 0x39f   : > { %v1033_v56 = vpop.xlane.xlu1 %1032 }
 0x3a0   : > { %v1034_v61 = vsub.f32 %v1030_v46, %v1033_v56 }
 0x3a2   : > { %v1035_v0 = vmul.f32 1.442695, %v1034_v61 }
 0x3a6   : > { %v907_v52 = vpop.xlane.xlu2 %906 }
 0x3a7   : > { %v908_v54 = vsub.f32 %v904_v50, %v907_v52  ;;  %v793_v50 = vld [vmem:[%s2592_s2 + $0x18] sm:$0xff] }
 0x3a9   : > { %v2310_v53 = vpop.f32.mrf.mxu3  ;;  %v909_v57 = vmul.f32 1.442695, %v908_v54 }
 0x3ab   : > { %2050 = vpow2.f32 %v909_v57 }
 0x3ac   : > { %2052 = vpow2.f32 %v1035_v0 }
 0x3ae   : > { %v930_v55 = vpop.permute.xlu2 %929 }
 0x3af   : > { %950 = vmatpush.msra.mxu2 %v930_v55 }
 0x3b1   : > { %v1130_v58 = vpop.f32.mrf.mxu3  ;;  %v2051_v1 = vpop.eup %2050 }
 0x3b2   : > { %v1133_v59 = vmul.f32 0.35355338, %v1130_v58  ;;  %v911_v2 = vsel %vm798_vm1, %v2051_v1, 0.0  ;;  %v2315_v3 = vpop.eup %2052 }
 0x3b3   : > { %v1037_v5 = vsel %vm798_vm1, %v2315_v3, 0.0 }
 0x3b4   : > { %v1134_v60 = vadd.f32 %v1133_v59, %v2285_v19 }
 0x3b6   : > { %v1135_v62 = vsel %vm798_vm1, %v1134_v60, -inf }
 0x3b7   : > { %1136 = vmax.xlane.f32.xlu0 %v1135_v62  ;;  %v1160_v63 = vpop.permute.xlu1 %1159 }
 0x3b8   : > { %1180 = vmatpush.msra.mxu0 %v1160_v63 }
 0x3bf   : > { %912 = vadd.xlane.f32.xlu0 %v911_v2 }
 0x3c7   : > { %1038 = vadd.xlane.f32.xlu0 %v1037_v5 }
 0x42a   : > { %v1137_v6 = vpop.xlane.xlu0 %1136 }
 0x42b   : > { %v1138_v8 = vsub.f32 %v1134_v60, %v1137_v6 }
 0x42d   : > { %v1139_v9 = vmul.f32 1.442695, %v1138_v8 }
 0x42f   : > { %2054 = vpow2.f32 %v1139_v9 }
 0x432   : > { %v913_v10 = vpop.xlane.xlu0 %912 }
 0x433   : > { %2056 = vrcp.f32 %v913_v10  ;;  %v925_v16 = vand.u32 2147483648, %v913_v10  ;;  %v923_v18 = vand.u32 2147483647, %v913_v10  ;;  %vm919_vm8 = vweird.f32 %v913_v10 }
 0x435   : > { %v2055_v11 = vpop.eup %2054  ;;  %v926_v20 = vor.u32 1.1754944e-38, %v925_v16  ;;  %vm924_vm10 = vcmp.eq.f32.partialorder %v923_v18, 8.507059e+37  ;;  %v1284_v16 = vld [vmem:[%s2552_s10] sm:$0xff]  ;;  %v1256_v18 = vld [vmem:[%s2595_s0 + $0x18] sm:$0xff] }
 0x436   : > { %v1141_v12 = vsel %vm798_vm1, %v2055_v11, 0.0 }
 0x437   : > { %1142 = vadd.xlane.f32.xlu0 %v1141_v12 }
 0x439   : > { %v2057_v13 = vpop.eup %2056 }
 0x43a   : > { %v915_v14 = vmul.f32 %v2057_v13, %v913_v10  ;;  %vm920_vm7 = vweird.f32 %v2057_v13  ;;  %v1039_v24 = vpop.xlane.xlu0 %1038 }
 0x43b   : > { %vm921_vm9 = vmor %vm919_vm8, %vm920_vm7  ;;  %2058 = vrcp.f32 %v1039_v24  ;;  %v1051_v34 = vand.u32 2147483648, %v1039_v24  ;;  %vm1045_vm12 = vweird.f32 %v1039_v24 }
 0x43c   : > { %v916_v15 = vsub.f32 1.0, %v915_v14  ;;  %v1286_v14 = vld [vmem:[%s2552_s10 + $0x10] sm:$0xff] }
 0x43d   : > { %v1052_v40 = vor.u32 1.1754944e-38, %v1051_v34  ;;  %v2035_v34 = vld [vmem:[%s2597_s28] ss:$0 sm:$0xff]  ;;  %s749_s28 = scalar_lea.vmem %s2566_s24, %s2252_s25 }
 0x43e   : > { %v917_v17 = vmul.f32 %v2057_v13, %v916_v15  ;;  %v1285_v15 = vld [vmem:[%s2552_s10 + $0x8] sm:$0xff] }
 0x440   : > { %v918_v19 = vadd.f32 %v2057_v13, %v917_v17  ;;  %v751_v17 = vld [vmem:[%s745_s7] sm:$0xff] }
 0x441   : > { %v2059_v25 = vpop.eup %2058 }
 0x442   : > { %v922_v21 = vsel %vm921_vm9, %v2057_v13, %v918_v19  ;;  %v1041_v26 = vmul.f32 %v2059_v25, %v1039_v24  ;;  %vm1046_vm11 = vweird.f32 %v2059_v25  ;;  %v1255_v19 = vld [vmem:[%s2595_s0 + $0x10] sm:$0xff] }
 0x443   : > { %v927_v22 = vsel %vm924_vm10, %v926_v20, %v922_v21  ;;  %vm1047_vm13 = vmor %vm1045_vm12, %vm1046_vm11  ;;  %v1254_v20 = vld [vmem:[%s2595_s0 + $0x8] sm:$0xff]  ;;  %v1253_v21 = vld [vmem:[%s2595_s0] sm:$0xff] }
 0x444   : > { %v928_v23 = vmul.f32 %v2051_v1, %v927_v22  ;;  %v1042_v29 = vsub.f32 1.0, %v1041_v26  ;;  %v2106_v1 = vmov 32.0  }
 0x446   : > { %1977 = vmatmul.msk.f32.vlgmr.msra.gmra.mxu2 %vm798_vm1, %v928_v23  ;;  %v1043_v30 = vmul.f32 %v2059_v25, %v1042_v29 }
 0x448   : > { %v1044_v33 = vadd.f32 %v2059_v25, %v1043_v30 }
 0x44a   : > { %v1048_v39 = vsel %vm1047_vm13, %v2059_v25, %v1044_v33 }
 0x44b   : > { %1055 = vrot.lane.b32.xlu0 %v2265_v7, %s2105_s27  ;;  %v1049_v7 = vand.u32 2147483647, %v1039_v24  ;;  %s2593_s27 = sld [smem:[#allocation7_spill]] }
 0x44d   : > { %vm1050_vm2 = vcmp.eq.f32.partialorder %v1049_v7, 8.507059e+37 }
 0x44e   : > { %v1053_v44 = vsel %vm1050_vm2, %v1052_v40, %v1048_v39  ;;  %v2037_v39 = vld [vmem:[%s2551_s9] ss:$0 sm:$0xff] }
 0x44f   : > { %v1054_v48 = vmul.f32 %v2315_v3, %v1053_v44 }
 0x451   : > { %v2033_v59 = vld [vmem:[%s2593_s27] ss:$0 sm:$0xff] }
 0x4aa   : > { %v1143_v28 = vpop.xlane.xlu0 %1142 }
 0x4ab   : > { %2060 = vrcp.f32 %v1143_v28  ;;  %v1155_v36 = vand.u32 2147483648, %v1143_v28  ;;  %v1153_v38 = vand.u32 2147483647, %v1143_v28  ;;  %vm1149_vm15 = vweird.f32 %v1143_v28 }
 0x4ac   : > { %2062 = vrcp.f32 %v2106_v1 }
 0x4ad   : > { %v1156_v42 = vor.u32 1.1754944e-38, %v1155_v36  ;;  %vm1154_vm4 = vcmp.eq.f32.partialorder %v1153_v38, 8.507059e+37  ;;  %v2036_v36 = vld [vmem:[%s2553_s11] ss:$0 sm:$0xff] }
 0x4b1   : > { %v2061_v31 = vpop.eup %2060 }
 0x4b2   : > { %v1145_v32 = vmul.f32 %v2061_v31, %v1143_v28  ;;  %vm1150_vm14 = vweird.f32 %v2061_v31  ;;  %v2063_v2 = vpop.eup %2062 }
 0x4b3   : > { %vm1151_vm3 = vmor %vm1149_vm15, %vm1150_vm14  ;;  %v1220_v3 = vmul.f32 32.0, %v2063_v2  ;;  %vm1224_vm5 = vweird.f32 %v2063_v2 }
 0x4b4   : > { %v1146_v35 = vsub.f32 1.0, %v1145_v32 }
 0x4b5   : > { %v1221_v5 = vsub.f32 1.0, %v1220_v3 }
 0x4b6   : > { %v1147_v37 = vmul.f32 %v2061_v31, %v1146_v35 }
 0x4b7   : > { %v1222_v6 = vmul.f32 %v2063_v2, %v1221_v5 }
 0x4b8   : > { %v1148_v41 = vadd.f32 %v2061_v31, %v1147_v37 }
 0x4b9   : > { %v1223_v8 = vadd.f32 %v2063_v2, %v1222_v6 }
 0x4ba   : > { %v1152_v43 = vsel %vm1151_vm3, %v2061_v31, %v1148_v41  ;;  %v2034_v31 = vld [vmem:[%s2596_s30] ss:$0 sm:$0xff]  ;;  %s2600_s30 = smov 112  }
 0x4bb   : > { %v1157_v45 = vsel %vm1154_vm4, %v1156_v42, %v1152_v43  ;;  %v2346_v9 = vsel %vm1224_vm5, %v2063_v2, %v1223_v8 }
 0x4bc   : > { %v1158_v46 = vmul.f32 %v2055_v11, %v1157_v45 }
 0x4bd   : > { %v1056_v47 = vpop.permute.xlu0 %1055 }
 0x4be   : > { %1076 = vmatpush.msrb.mxu2 %v1056_v47  ;;  %1986 = vmatmul.msk.f32.vlgmr.msra.gmra.mxu0 %vm798_vm1, %v1158_v46 }
 0x4bf   : > { %1982 = vmatmul.msk.f32.vlgmr.msrb.gmra.mxu2 %vm798_vm1, %v1054_v48 }
 0x4c0   : > { %1203 = vmatpush.msra.mxu2 %v793_v50 }
 0x4c9   : > { %v952_v49 = vpop.f32.mrf.mxu2 }
 0x4ca   : > { %1978 = vmatmul.msk.f32.vlgmr.msrb.gmra.mxu1 %vm798_vm1, %v952_v49 }
 0x4cb   : > { %1276 = vmatpush.msrb.mxu1 %v1256_v18 }
 0x4cd   : > { %1277 = vmatpush.msrb.mxu1 %v1255_v19 }
 0x4cf   : > { %1278 = vmatpush.msrb.mxu1 %v1254_v20 }
 0x4d1   : > { %1279 = vmatpush.msrb.mxu1 %v1253_v21 }
 0x53b   : > { %v1182_v52 = vpop.f32.mrf.mxu0 }
 0x53c   : > { %1987 = vmatmul.msk.f32.vlgmr.msra.gmra.mxu2 %vm798_vm1, %v1182_v52 }
 0x542   : > { %v1078_v54 = vpop.f32.mrf.mxu2 }
 0x543   : > { %1983 = vmatmul.msk.f32.vlgmr.msra.gmra.mxu1 %vm798_vm1, %v1078_v54  ;;  %v1315_v54 = vld [vmem:[%s2554_s12] sm:$0xff] }
 0x547   : > { %v975_v55 = vpop.f32.mrf.mxu1 }
 0x548   : > { %v999_v56 = vadd.f32 %v2310_v53, %v975_v55  ;;  %v1287_v53 = vld [vmem:[%s2552_s10 + $0x18] sm:$0xff] }
 0x549   : > { %1307 = vmatpush.msra.mxu3 %v1287_v53 }
 0x54b   : > { %1308 = vmatpush.msra.mxu3 %v1286_v14 }
 0x54d   : > { %1309 = vmatpush.msra.mxu3 %v1285_v15 }
 0x54f   : > { %1310 = vmatpush.msra.mxu3 %v1284_v16 }
 0x550   : > { %1989 = vmatmul.msk.f32.vlgmr.msra.gmra.mxu3 %vm766_vm0, %v751_v17 }
 0x5bf   : > { %v1205_v60 = vpop.f32.mrf.mxu2 }
 0x5c0   : > { %v1101_v57 = vpop.f32.mrf.mxu1 }
 0x5c1   : > { %v1104_v58 = vadd.f32 %v1101_v57, %v999_v56 }
 0x5c3   : > { %v1208_v61 = vadd.f32 %v1205_v60, %v1104_v58 }
 0x5c5   : > { %v1212_v62 = vadd.f32 %v2033_v59, %v1208_v61 }
 0x5c7   : > { %v1213_v63 = vadd.f32 %v1212_v62, %v2258_v4 }
 0x5c9   : > { %v1216_v0 = vsel %vm766_vm0, %v1213_v63, 0.0 }
 0x5ca   : > { %1217 = vadd.xlane.f32.xlu0 %v1216_v0 }
 0x5d3   : > { %v1312_v37 = vpop.f32.mrf.mxu3 }
 0x5d4   : > { %v2390_v38 = vadd.f32 %v2036_v36, %v1312_v37 }
 0x5d6   : > { %1990 = vmatpush.xpose.msk.msrb.mxu0 %vm798_vm1, %v2390_v38 }
 0x63d   : > { %v1218_v4 = vpop.xlane.xlu0 %1217 }
 0x63e   : > { %v1226_v10 = vmul.f32 %v2346_v9, %v1218_v4 }
 0x640   : > { %v1227_v11 = vsub.f32 %v1213_v63, %v1226_v10 }
 0x642   : > { %v1228_v12 = vmul.f32 %v1227_v11, %v1227_v11 }
 0x644   : > { %v1229_v13 = vsel %vm766_vm0, %v1228_v12, 0.0 }
 0x645   : > { %1230 = vadd.xlane.f32.xlu2 %v1229_v13 }
 0x65d   : > { %1371 = vrot.lane.b32.xlu2 %v2390_v38, %s2598_s3  ;;  %s2604_s3 = smov 72  }
 0x665   : > { %1627 = vrot.lane.b32.xlu2 %v2390_v38, %s2599_s1 }
 0x6b8   : > { %v1231_v22 = vpop.xlane.xlu2 %1230 }
 0x6b9   : > { %v1232_v23 = vmul.f32 %v1231_v22, %v2346_v9 }
 0x6bb   : > { %v1233_v24 = vadd.f32 1e-05, %v1232_v23 }
 0x6bd   : > { %2064 = vrsqrt.f32 %v1233_v24  ;;  %vm1240_vm7 = vweird.f32 %v1233_v24 }
 0x6c0   : > { %v1372_v42 = vpop.permute.xlu2 %1371 }
 0x6c1   : > { %1392 = vmatpush.msrb.mxu2 %v1372_v42 }
 0x6c3   : > { %v2065_v25 = vpop.eup %2064  ;;  %1517 = vmatpush.msra.mxu2 %v1315_v54 }
 0x6c4   : > { %v1235_v26 = vmul.f32 %v2065_v25, %v1233_v24  ;;  %vm1241_vm6 = vweird.f32 %v2065_v25 }
 0x6c5   : > { %vm1242_vm8 = vmor %vm1240_vm7, %vm1241_vm6 }
 0x6c6   : > { %v1236_v27 = vmul.f32 %v2065_v25, %v1235_v26 }
 0x6c8   : > { %v1237_v28 = vmul.f32 0.5, %v1236_v27  ;;  %v1628_v1 = vpop.permute.xlu2 %1627 }
 0x6ca   : > { %v1238_v29 = vsub.f32 1.5, %v1237_v28 }
 0x6cc   : > { %v1239_v30 = vmul.f32 %v2065_v25, %v1238_v29 }
 0x6ce   : > { %v1243_v32 = vsel %vm1242_vm8, %v2065_v25, %v1239_v30 }
 0x6cf   : > { %v1244_v33 = vmul.f32 %v1243_v32, %v1227_v11 }
 0x6d1   : > { %v1248_v35 = vmul.f32 %v2034_v31, %v1244_v33 }
 0x6d3   : > { %v2383_v7 = vadd.f32 %v2035_v34, %v1248_v35 }
 0x6d5   : > { %1988 = vmatmul.msk.f32.vlgmr.msrb.gmra.mxu1 %vm766_vm0, %v2383_v7 }
 0x752   : > { %v1281_v40 = vpop.f32.mrf.mxu1 }
 0x753   : > { %v1282_v41 = vadd.f32 %v2037_v39, %v1281_v40 }
 0x755   : > { %1522 = vrot.lane.b32.xlu2 %v1282_v41, %s2600_s30  ;;  %1991 = vmatmul.msk.f32.vlgmr.msrb.gmra.mxu0 %vm798_vm1, %v1282_v41 }
 0x7af   : > { %v1523_v5 = vpop.permute.xlu2 %1522 }
 0x7d2   : > { %v1343_v43 = vpop.f32.mrf.mxu0 }
 0x7d3   : > { %v1346_v44 = vmul.f32 0.35355338, %v1343_v43 }
 0x7d5   : > { %v1347_v45 = vsel %vm798_vm1, %v1346_v44, -inf }
 0x7d6   : > { %1348 = vmax.xlane.f32.xlu1 %v1347_v45 }
 0x7ef   : > { %1399 = vrot.lane.b32.xlu1 %v2390_v38, %s2601_s4 }
 0x7f7   : > { %1524 = vrot.lane.b32.xlu1 %v2390_v38, %s2600_s30 }
 0x849   : > { %v1349_v46 = vpop.xlane.xlu1 %1348 }
 0x84a   : > { %v1350_v47 = vsub.f32 %v1346_v44, %v1349_v46 }
 0x84c   : > { %v1351_v48 = vmul.f32 1.442695, %v1350_v47 }
 0x84e   : > { %2066 = vpow2.f32 %v1351_v48 }
 0x854   : > { %v2067_v49 = vpop.eup %2066 }
 0x855   : > { %v1353_v50 = vsel %vm798_vm1, %v2067_v49, 0.0 }
 0x856   : > { %1354 = vadd.xlane.f32.xlu0 %v1353_v50 }
 0x861   : > { %v1400_v51 = vpop.permute.xlu1 %1399 }
 0x862   : > { %1993 = vmatpush.xpose.msk.msra.mxu1 %vm798_vm1, %v1400_v51 }
 0x869   : > { %v1525_v52 = vpop.permute.xlu1 %1524 }
 0x86a   : > { %1397 = vrot.lane.b32.xlu0 %v1282_v41, %s2601_s4  ;;  %1998 = vmatpush.xpose.msk.msrb.mxu1 %vm798_vm1, %v1525_v52 }
 0x872   : > { %1625 = vrot.lane.b32.xlu0 %v1282_v41, %s2599_s1 }
 0x8c9   : > { %v1355_v55 = vpop.xlane.xlu0 %1354 }
 0x8ca   : > { %2068 = vrcp.f32 %v1355_v55  ;;  %v1367_v59 = vand.u32 2147483648, %v1355_v55  ;;  %v1365_v61 = vand.u32 2147483647, %v1355_v55  ;;  %vm1361_vm10 = vweird.f32 %v1355_v55 }
 0x8cc   : > { %v1368_v63 = vor.u32 1.1754944e-38, %v1367_v59  ;;  %vm1366_vm12 = vcmp.eq.f32.partialorder %v1365_v61, 8.507059e+37 }
 0x8d0   : > { %v2069_v56 = vpop.eup %2068 }
 0x8d1   : > { %v1357_v57 = vmul.f32 %v2069_v56, %v1355_v55  ;;  %vm1362_vm9 = vweird.f32 %v2069_v56 }
 0x8d2   : > { %vm1363_vm11 = vmor %vm1361_vm10, %vm1362_vm9 }
 0x8d3   : > { %v1358_v58 = vsub.f32 1.0, %v1357_v57 }
 0x8d5   : > { %v1359_v60 = vmul.f32 %v2069_v56, %v1358_v58 }
 0x8d7   : > { %v1360_v62 = vadd.f32 %v2069_v56, %v1359_v60 }
 0x8d9   : > { %v1364_v0 = vsel %vm1363_vm11, %v2069_v56, %v1360_v62  ;;  %v1316_v62 = vld [vmem:[%s2554_s12 + $0x8] sm:$0xff] }
 0x8da   : > { %v1369_v53 = vsel %vm1366_vm12, %v1368_v63, %v1364_v0  ;;  %1494 = vmatpush.msra.mxu0 %v1316_v62  ;;  %v1317_v63 = vld [vmem:[%s2554_s12 + $0x10] sm:$0xff] }
 0x8db   : > { %v1370_v2 = vmul.f32 %v2067_v49, %v1369_v53 }
 0x8dc   : > { %v1398_v3 = vpop.permute.xlu0 %1397  ;;  %1619 = vmatpush.msrb.mxu0 %v1317_v63 }
 0x8dd   : > { %1992 = vmatmul.msk.f32.vlgmr.msrb.gmra.mxu2 %vm798_vm1, %v1370_v2  ;;  %1994 = vmatmul.msk.f32.vlgmr.msra.gmra.mxu1 %vm798_vm1, %v1398_v3 }
 0x8de   : > { %2002 = vmatpush.xpose.msk.msrb.mxu2 %vm798_vm1, %v1628_v1 }
 0x8e4   : > { %v1626_v14 = vpop.permute.xlu0 %1625 }
 0x8e5   : > { %1999 = vmatmul.msk.f32.vlgmr.msrb.gmra.mxu1 %vm798_vm1, %v1523_v5 }
 0x95a   : > { %v1422_v6 = vpop.f32.mrf.mxu1 }
 0x95b   : > { %v1425_v8 = vmul.f32 0.35355338, %v1422_v6 }
 0x95d   : > { %v1426_v4 = vsel %vm798_vm1, %v1425_v8, -inf }
 0x95e   : > { %1427 = vmax.xlane.f32.xlu0 %v1426_v4 }
 0x960   : > { %v1394_v10 = vpop.f32.mrf.mxu2 }
 0x961   : > { %1997 = vmatmul.msk.f32.vlgmr.msra.gmra.mxu2 %vm798_vm1, %v1394_v10 }
 0x962   : > { %v1547_v11 = vpop.f32.mrf.mxu1 }
 0x963   : > { %v1550_v12 = vmul.f32 0.35355338, %v1547_v11 }
 0x965   : > { %v1551_v13 = vsel %vm798_vm1, %v1550_v12, -inf }
 0x966   : > { %1552 = vmax.xlane.f32.xlu1 %v1551_v13 }
 0x969   : > { %2003 = vmatmul.msk.f32.vlgmr.msrb.gmra.mxu2 %vm798_vm1, %v1626_v14 }
 0x9d1   : > { %v1428_v15 = vpop.xlane.xlu0 %1427 }
 0x9d2   : > { %v1429_v16 = vsub.f32 %v1425_v8, %v1428_v15  ;;  %v1318_v15 = vld [vmem:[%s2554_s12 + $0x18] sm:$0xff] }
 0x9d4   : > { %v1430_v17 = vmul.f32 1.442695, %v1429_v16 }
 0x9d6   : > { %2070 = vpow2.f32 %v1430_v17 }
 0x9d9   : > { %v1553_v18 = vpop.xlane.xlu1 %1552 }
 0x9da   : > { %v1554_v19 = vsub.f32 %v1550_v12, %v1553_v18 }
 0x9dc   : > { %v2071_v20 = vpop.eup %2070  ;;  %v1555_v21 = vmul.f32 1.442695, %v1554_v19 }
 0x9dd   : > { %v1432_v22 = vsel %vm798_vm1, %v2071_v20, 0.0 }
 0x9de   : > { %2072 = vpow2.f32 %v1555_v21  ;;  %1433 = vadd.xlane.f32.xlu0 %v1432_v22  ;;  %v2038_v21 = vld [vmem:[%s2555_s13] ss:$0 sm:$0xff] }
 0x9e4   : > { %v2073_v23 = vpop.eup %2072  ;;  %v2425_v24 = vpop.f32.mrf.mxu2 }
 0x9e5   : > { %v1557_v25 = vsel %vm798_vm1, %v2073_v23, 0.0 }
 0x9e6   : > { %1558 = vadd.xlane.f32.xlu1 %v1557_v25 }
 0x9ec   : > { %v1650_v26 = vpop.f32.mrf.mxu2 }
 0x9ed   : > { %v1653_v27 = vmul.f32 0.35355338, %v1650_v26 }
 0x9ef   : > { %v1654_v28 = vsel %vm798_vm1, %v1653_v27, -inf }
 0x9f0   : > { %1655 = vmax.xlane.f32.xlu2 %v1654_v28 }
 0x9f2   : > { %1450 = vrot.lane.b32.xlu0 %v2390_v38, %s2602_s26 }
 0x9ff   : > { %1575 = vrot.lane.b32.xlu1 %v2390_v38, %s2603_s8 }
 0xa51   : > { %v1434_v29 = vpop.xlane.xlu0 %1433 }
 0xa52   : > { %2074 = vrcp.f32 %v1434_v29  ;;  %v1446_v34 = vand.u32 2147483648, %v1434_v29  ;;  %v1444_v36 = vand.u32 2147483647, %v1434_v29  ;;  %vm1440_vm14 = vweird.f32 %v1434_v29 }
 0xa54   : > { %v1447_v40 = vor.u32 1.1754944e-38, %v1446_v34  ;;  %vm1445_vm2 = vcmp.eq.f32.partialorder %v1444_v36, 8.507059e+37  ;;  %v1765_v34 = vld [vmem:[%s2558_s16] sm:$0xff]  ;;  %v1803_v36 = vld [vmem:[%s2560_s18 + $0x30] sm:$0xff] }
 0xa58   : > { %v2075_v30 = vpop.eup %2074 }
 0xa59   : > { %v1436_v31 = vmul.f32 %v2075_v30, %v1434_v29  ;;  %v1559_v32 = vpop.xlane.xlu1 %1558  ;;  %vm1441_vm13 = vweird.f32 %v2075_v30 }
 0xa5a   : > { %2076 = vrcp.f32 %v1559_v32  ;;  %vm1442_vm15 = vmor %vm1440_vm14, %vm1441_vm13  ;;  %v1571_v52 = vand.u32 2147483648, %v1559_v32  ;;  %vm1565_vm4 = vweird.f32 %v1559_v32  ;;  %v1569_v54 = vand.u32 2147483647, %v1559_v32 }
 0xa5b   : > { %v1437_v33 = vsub.f32 1.0, %v1436_v31  ;;  %vm1809_vm13 = vcmask 523264  }
 0xa5c   : > { %v1572_v56 = vor.u32 1.1754944e-38, %v1571_v52  ;;  %vm1570_vm6 = vcmp.eq.f32.partialorder %v1569_v54, 8.507059e+37  ;;  %v2040_v54 = vld [vmem:[%s2557_s15] ss:$0 sm:$0xff] }
 0xa5d   : > { %v1438_v35 = vmul.f32 %v2075_v30, %v1437_v33  ;;  %v1766_v33 = vld [vmem:[%s2558_s16 + $0x8] sm:$0xff] }
 0xa5f   : > { %v1439_v37 = vadd.f32 %v2075_v30, %v1438_v35  ;;  %v1804_v35 = vld [vmem:[%s2560_s18 + $0x38] sm:$0xff] }
 0xa60   : > { %v2077_v39 = vpop.eup %2076  ;;  %1821 = vmatpush.msra.mxu2 %v1804_v35 }
 0xa61   : > { %v1443_v41 = vsel %vm1442_vm15, %v2075_v30, %v1439_v37  ;;  %v1561_v42 = vmul.f32 %v2077_v39, %v1559_v32  ;;  %vm1566_vm3 = vweird.f32 %v2077_v39  ;;  %v1768_v32 = vld [vmem:[%s2558_s16 + $0x18] sm:$0xff]  ;;  %v1802_v37 = vld [vmem:[%s2560_s18 + $0x28] sm:$0xff] }
 0xa62   : > { %v1448_v43 = vsel %vm1445_vm2, %v1447_v40, %v1443_v41  ;;  %vm1567_vm5 = vmor %vm1565_vm4, %vm1566_vm3  ;;  %1822 = vmatpush.msra.mxu2 %v1803_v36  ;;  %v1801_v41 = vld [vmem:[%s2560_s18 + $0x20] sm:$0xff] }
 0xa63   : > { %v1562_v44 = vsub.f32 1.0, %v1561_v42  ;;  %v1656_v45 = vpop.xlane.xlu2 %1655  ;;  %v1449_v46 = vmul.f32 %v2071_v20, %v1448_v43  ;;  %v1800_v43 = vld [vmem:[%s2560_s18 + $0x18] sm:$0xff] }
 0xa64   : > { %v1657_v47 = vsub.f32 %v1653_v27, %v1656_v45  ;;  %v1451_v48 = vpop.permute.xlu0 %1450  ;;  %1823 = vmatpush.msra.mxu2 %v1802_v37 }
 0xa65   : > { %v1563_v49 = vmul.f32 %v2077_v39, %v1562_v44  ;;  %1471 = vmatpush.msrb.mxu3 %v1451_v48 }
 0xa66   : > { %v1658_v50 = vmul.f32 1.442695, %v1657_v47  ;;  %1995 = vmatmul.msk.f32.vlgmr.msrb.gmra.mxu3 %vm798_vm1, %v1449_v46  ;;  %1824 = vmatpush.msra.mxu2 %v1801_v41 }
 0xa67   : > { %v1564_v51 = vadd.f32 %v2077_v39, %v1563_v49 }
 0xa68   : > { %2078 = vpow2.f32 %v1658_v50  ;;  %1825 = vmatpush.msra.mxu2 %v1800_v43  ;;  %v2039_v50 = vld [vmem:[%s2556_s14] ss:$0 sm:$0xff] }
 0xa69   : > { %v1568_v55 = vsel %vm1567_vm5, %v2077_v39, %v1564_v51 }
 0xa6a   : > { %v1573_v58 = vsel %vm1570_vm6, %v1572_v56, %v1568_v55 }
 0xa6b   : > { %v1574_v61 = vmul.f32 %v2073_v23, %v1573_v58  ;;  %v1798_v58 = vld [vmem:[%s2560_s18 + $0x8] sm:$0xff] }
 0xa6e   : > { %v2079_v57 = vpop.eup %2078 }
 0xa6f   : > { %v1660_v59 = vsel %vm798_vm1, %v2079_v57, 0.0 }
 0xa70   : > { %1661 = vadd.xlane.f32.xlu2 %v1660_v59  ;;  %v1797_v59 = vld [vmem:[%s2560_s18] sm:$0xff] }
 0xa71   : > { %v1576_v60 = vpop.permute.xlu1 %1575 }
 0xa72   : > { %1596 = vmatpush.msra.mxu3 %v1576_v60  ;;  %v2041_v60 = vld [vmem:[%s2559_s17] ss:$0 sm:$0xff] }
 0xa73   : > { %2000 = vmatmul.msk.f32.vlgmr.msra.gmra.mxu3 %vm798_vm1, %v1574_v61 }
 0xa74   : > { %1722 = vmatpush.msrb.mxu3 %v1318_v15 }
 0xa88   : > { %1678 = vrot.lane.b32.xlu2 %v2390_v38, %s2604_s3 }
 0xae3   : > { %v1662_v0 = vpop.xlane.xlu2 %1661 }
 0xae4   : > { %2080 = vrcp.f32 %v1662_v0  ;;  %v1674_v5 = vand.u32 2147483648, %v1662_v0  ;;  %v1672_v8 = vand.u32 2147483647, %v1662_v0  ;;  %vm1668_vm8 = vweird.f32 %v1662_v0 }
 0xae6   : > { %v1675_v10 = vor.u32 1.1754944e-38, %v1674_v5  ;;  %vm1673_vm10 = vcmp.eq.f32.partialorder %v1672_v8, 8.507059e+37 }
 0xae9   : > { %v1473_v1 = vpop.f32.mrf.mxu3 }
 0xaea   : > { %v2081_v53 = vpop.eup %2080  ;;  %1996 = vmatmul.msk.f32.vlgmr.msra.gmra.mxu0 %vm798_vm1, %v1473_v1 }
 0xaeb   : > { %v1664_v2 = vmul.f32 %v2081_v53, %v1662_v0  ;;  %v1679_v3 = vpop.permute.xlu2 %1678  ;;  %vm1669_vm7 = vweird.f32 %v2081_v53  ;;  %1788 = vmatpush.msra.mxu0 %v1768_v32  ;;  %v2042_v0 = vld [vmem:[%s2561_s19] ss:$0 sm:$0xff] }
 0xaec   : > { %1699 = vmatpush.msra.mxu1 %v1679_v3  ;;  %vm1670_vm9 = vmor %vm1668_vm8, %vm1669_vm7 }
 0xaed   : > { %v1665_v38 = vsub.f32 1.0, %v1664_v2 }
 0xaef   : > { %v1666_v6 = vmul.f32 %v2081_v53, %v1665_v38 }
 0xaf1   : > { %v1667_v4 = vadd.f32 %v2081_v53, %v1666_v6 }
 0xaf3   : > { %v1671_v11 = vsel %vm1670_vm9, %v2081_v53, %v1667_v4 }
 0xaf4   : > { %v1676_v12 = vsel %vm1673_vm10, %v1675_v10, %v1671_v11  ;;  %v1869_v10 = vld [vmem:[%s2564_s22 + $0x18] sm:$0xff]  ;;  %v1868_v11 = vld [vmem:[%s2564_s22 + $0x10] sm:$0xff] }
 0xaf5   : > { %v1677_v13 = vmul.f32 %v2079_v57, %v1676_v12  ;;  %v1799_v57 = vld [vmem:[%s2560_s18 + $0x10] sm:$0xff]  ;;  %1889 = vmatpush.msrb.mxu1 %v1869_v10  ;;  %v1867_v12 = vld [vmem:[%s2564_s22 + $0x8] sm:$0xff] }
 0xaf6   : > { %v1598_v14 = vpop.f32.mrf.mxu3  ;;  %1826 = vmatpush.msra.mxu2 %v1799_v57 }
 0xaf7   : > { %2001 = vmatmul.msk.f32.vlgmr.msrb.gmra.mxu0 %vm798_vm1, %v1598_v14  ;;  %2004 = vmatmul.msk.f32.vlgmr.msra.gmra.mxu1 %vm798_vm1, %v1677_v13  ;;  %v1866_v13 = vld [vmem:[%s2564_s22] sm:$0xff] }
 0xaf8   : > { %1827 = vmatpush.msra.mxu2 %v1798_v58  ;;  %1890 = vmatpush.msrb.mxu1 %v1868_v11 }
 0xafa   : > { %1828 = vmatpush.msra.mxu2 %v1797_v59  ;;  %1891 = vmatpush.msrb.mxu1 %v1867_v12 }
 0xafc   : > { %1892 = vmatpush.msrb.mxu1 %v1866_v13 }
 0xb67   : > { %v1496_v17 = vpop.f32.mrf.mxu0 }
 0xb68   : > { %v1520_v19 = vadd.f32 %v2425_v24, %v1496_v17 }
 0xb74   : > { %v1701_v16 = vpop.f32.mrf.mxu1  ;;  %v1621_v18 = vpop.f32.mrf.mxu0 }
 0xb75   : > { %2005 = vmatmul.msk.f32.vlgmr.msrb.gmra.mxu3 %vm798_vm1, %v1701_v16  ;;  %v1624_v20 = vadd.f32 %v1621_v18, %v1520_v19 }
 0xbf8   : > { %v1724_v22 = vpop.f32.mrf.mxu3 }
 0xbf9   : > { %v1727_v23 = vadd.f32 %v1724_v22, %v1624_v20 }
 0xbfb   : > { %v1731_v25 = vadd.f32 %v2038_v21, %v1727_v23  ;;  %v2043_v23 = vld [vmem:[%s2562_s20] ss:$0 sm:$0xff] }
 0xbfd   : > { %v1732_v26 = vadd.f32 %v1731_v25, %v2383_v7  ;;  %v1767_v7 = vld [vmem:[%s2558_s16 + $0x10] sm:$0xff] }
 0xbfe   : > { %1789 = vmatpush.msra.mxu0 %v1767_v7 }
 0xbff   : > { %v1735_v27 = vsel %vm766_vm0, %v1732_v26, 0.0 }
 0xc00   : > { %1736 = vadd.xlane.f32.xlu0 %v1735_v27  ;;  %1790 = vmatpush.msra.mxu0 %v1766_v33 }
 0xc02   : > { %1791 = vmatpush.msra.mxu0 %v1765_v34 }
 0xc73   : > { %v1737_v28 = vpop.xlane.xlu0 %1736 }
 0xc74   : > { %v1738_v29 = vmul.f32 %v1737_v28, %v2346_v9 }
 0xc76   : > { %v1739_v30 = vsub.f32 %v1732_v26, %v1738_v29  ;;  %v2045_v29 = vld [vmem:[%s2565_s23] ss:$0 sm:$0xff] }
 0xc78   : > { %v1740_v31 = vmul.f32 %v1739_v30, %v1739_v30 }
 0xc7a   : > { %v1741_v24 = vsel %vm766_vm0, %v1740_v31, 0.0 }
 0xc7b   : > { %1742 = vadd.xlane.f32.xlu1 %v1741_v24 }
 0xcee   : > { %v1743_v39 = vpop.xlane.xlu1 %1742 }
 0xcef   : > { %v1744_v40 = vmul.f32 %v1743_v39, %v2346_v9 }
 0xcf1   : > { %v1745_v42 = vadd.f32 1e-05, %v1744_v40 }
 0xcf3   : > { %2082 = vrsqrt.f32 %v1745_v42  ;;  %vm1752_vm11 = vweird.f32 %v1745_v42 }
 0xcf9   : > { %v2083_v44 = vpop.eup %2082 }
 0xcfa   : > { %v1747_v45 = vmul.f32 %v2083_v44, %v1745_v42  ;;  %vm1753_vm1 = vweird.f32 %v2083_v44 }
 0xcfb   : > { %vm1754_vm12 = vmor %vm1752_vm11, %vm1753_vm1 }
 0xcfc   : > { %v1748_v46 = vmul.f32 %v2083_v44, %v1747_v45 }
 0xcfe   : > { %v1749_v47 = vmul.f32 0.5, %v1748_v46 }
 0xd00   : > { %v1750_v48 = vsub.f32 1.5, %v1749_v47 }
 0xd02   : > { %v1751_v49 = vmul.f32 %v2083_v44, %v1750_v48 }
 0xd04   : > { %v1755_v51 = vsel %vm1754_vm12, %v2083_v44, %v1751_v49 }
 0xd05   : > { %v1756_v52 = vmul.f32 %v1755_v51, %v1739_v30 }
 0xd07   : > { %v1760_v55 = vmul.f32 %v2039_v50, %v1756_v52 }
 0xd09   : > { %v1764_v56 = vadd.f32 %v2040_v54, %v1760_v55 }
 0xd0b   : > { %2006 = vmatmul.msk.f32.vlgmr.msra.gmra.mxu0 %vm766_vm0, %v1764_v56 }
 0xd88   : > { %v1793_v61 = vpop.f32.mrf.mxu0 }
 0xd89   : > { %v1794_v62 = vadd.f32 %v2041_v60, %v1793_v61 }
 0xd8b   : > { %v1796_v63 = vmax.f32 %v1794_v62, 0.0 }
 0xd8d   : > { %2007 = vmatmul.msk.f32.vlgmr.msra.gmra.mxu2 %vm1809_vm13, %v1796_v63 }
 0xe10   : > { %v1830_v1 = vpop.f32.mrf.mxu2 }
 0xe11   : > { %v1831_v53 = vadd.f32 %v2042_v0, %v1830_v1 }
 0xe13   : > { %v1833_v2 = vadd.f32 %v1831_v53, %v1764_v56 }
 0xe15   : > { %v1836_v3 = vsel %vm766_vm0, %v1833_v2, 0.0 }
 0xe16   : > { %1837 = vadd.xlane.f32.xlu2 %v1836_v3 }
 0xe89   : > { %v1838_v38 = vpop.xlane.xlu2 %1837 }
 0xe8a   : > { %v1839_v5 = vmul.f32 %v1838_v38, %v2346_v9 }
 0xe8c   : > { %v1840_v6 = vsub.f32 %v1833_v2, %v1839_v5 }
 0xe8e   : > { %v1841_v8 = vmul.f32 %v1840_v6, %v1840_v6 }
 0xe90   : > { %v1842_v4 = vsel %vm766_vm0, %v1841_v8, 0.0 }
 0xe91   : > { %1843 = vadd.xlane.f32.xlu0 %v1842_v4 }
 0xf04   : > { %v1844_v14 = vpop.xlane.xlu0 %1843 }
 0xf05   : > { %v1845_v15 = vmul.f32 %v1844_v14, %v2346_v9  ;;  %v2044_v9 = vld [vmem:[%s2563_s21] ss:$0 sm:$0xff] }
 0xf07   : > { %v1846_v16 = vadd.f32 1e-05, %v1845_v15 }
 0xf09   : > { %2084 = vrsqrt.f32 %v1846_v16  ;;  %vm1853_vm15 = vweird.f32 %v1846_v16 }
 0xf0f   : > { %v2085_v17 = vpop.eup %2084 }
 0xf10   : > { %v1848_v18 = vmul.f32 %v2085_v17, %v1846_v16  ;;  %vm1854_vm14 = vweird.f32 %v2085_v17 }
 0xf11   : > { %vm1855_vm2 = vmor %vm1853_vm15, %vm1854_vm14 }
 0xf12   : > { %v1849_v19 = vmul.f32 %v2085_v17, %v1848_v18 }
 0xf14   : > { %v1850_v20 = vmul.f32 0.5, %v1849_v19 }
 0xf16   : > { %v1851_v21 = vsub.f32 1.5, %v1850_v20 }
 0xf18   : > { %v1852_v22 = vmul.f32 %v2085_v17, %v1851_v21 }
 0xf1a   : > { %v1856_v25 = vsel %vm1855_vm2, %v2085_v17, %v1852_v22 }
 0xf1b   : > { %v1857_v26 = vmul.f32 %v1856_v25, %v1840_v6 }
 0xf1d   : > { %v1861_v27 = vmul.f32 %v2043_v23, %v1857_v26 }
 0xf1f   : > { %v1865_v28 = vadd.f32 %v2044_v9, %v1861_v27 }
 0xf21   : > { %2008 = vmatmul.msk.f32.vlgmr.msrb.gmra.mxu1 %vm766_vm0, %v1865_v28 }
 0xf9e   : > { %v1894_v30 = vpop.f32.mrf.mxu1 }
 0xf9f   : > { %v1895_v31 = vadd.f32 %v2045_v29, %v1894_v30 }
 0xfa1   : > { %1897 = vst [vmem:[%s749_s28] sm:$0xff] %v1895_v31 }
 0xfa2 PF: > { %s34_s5 = sadd.s32 1, %s2092_s5  }
 0xfa3   : > { %p31_p4 = scmp.ge.s32.totalorder %s34_s5, 4  }
 0xfa5   :  { %33 = sbr.rel (!%p31_p4) target bundleno = 10 (0xa), region = 149 }

</bundles_post_ra>
